<compile_context>
chip_gen: v7x
topology: tpu7x:2x2x1
jax: 0.10.0
libtpu: 0.0.40
codegen_flags: <defaults>
</compile_context>

<pallas_src>
import jax
import jax.numpy as jnp
import numpy as np
from jax import lax
from jax.experimental import pallas as pl
from jax.experimental.pallas import tpu as pltpu

INTERMEDIATE_CHANNELS = 196
LANE = 128


def _round_up(x, m):
    return (x + m - 1) // m * m


def _pick_row_tile(h, w, target_positions=1024):
    """Pick a row-tile TH (sublane dim => multiple of 8, or the full H)."""
    if h * w <= target_positions or h <= 8:
        return h
    th = max(8, (target_positions // max(w, 1)) // 8 * 8)
    return h if th >= h else th


# --------------------------------------------------------------------------
# Pallas kernels
# --------------------------------------------------------------------------
def _matmul_kernel(x_ref, w_ref, o_ref):
    # (TM, K) @ (K, N) -- 1x1 conv expressed as a row-tiled matmul.
    o_ref[...] = jnp.dot(
        x_ref[...], w_ref[...], preferred_element_type=jnp.float32
    ).astype(o_ref.dtype)


def _conv1x1_pallas(x, w_mat, out_dtype=jnp.bfloat16, tile_m=512):
    """1x1 conv, no bias. x: (..., Cin) bf16, w_mat: (Cin, Cout) bf16."""
    *lead, cin = x.shape
    cout = w_mat.shape[1]
    m = int(np.prod(lead))
    tm = min(tile_m, m)
    x2d = x.reshape(m, cin)
    out = pl.pallas_call(
        _matmul_kernel,
        out_shape=jax.ShapeDtypeStruct((m, cout), out_dtype),
        grid=(pl.cdiv(m, tm),),
        in_specs=[
            pl.BlockSpec((tm, cin), lambda i: (i, 0)),
            pl.BlockSpec((cin, cout), lambda i: (0, 0)),
        ],
        out_specs=pl.BlockSpec((tm, cout), lambda i: (i, 0)),
        compiler_params=pltpu.CompilerParams(
            dimension_semantics=("parallel",)),
    )(x2d, w_mat)
    return out.reshape(*lead, cout)


def _deconv_parity_kernel(x_ref, xn_ref, xbu_ref,
                          wa_ref, wb_ref, wc_ref, wd_ref,
                          wbu_ref, bias_ref, o_ref):
    # Block layouts (spatial W on the leading dim, row-tile TH on sublanes,
    # channels on lanes):
    #   x_ref   : (1, W, TH, Cp)      top-down features x[row, col]
    #   xn_ref  : (1, W, TH, Cp)      same, shifted one row down (tile halo)
    #   xbu_ref : (1, W, TH, 4*Cbup)  bottom-up feats packed per output parity
    #   wa..wd  : deconv taps (Cp, 4Fp/2Fp/2Fp/Fp), see prepare_fpn_params
    #   wbu_ref : (Cbup, Fp)          bottom-up 1x1 weight
    #   bias_ref: (1, 4*Fp) f32       deconv bias replicated per parity
    #   o_ref   : (1, W, TH, 4*Fp) f32, parities packed on lanes [ee|eo|oe|oo]
    th = x_ref.shape[2]
    cp = x_ref.shape[3]
    fp = wd_ref.shape[1]
    cbup = wbu_ref.shape[0]
    f32 = jnp.float32
    dn = (((2,), (0,)), ((), ()))

    x = x_ref[0]                                   # (W, TH, Cp)
    xn = xn_ref[0]                                 # x at row+1
    zrow = jnp.zeros((1, th, cp), x.dtype)
    # column shift x[:, col] -> x[:, col+1]; leading-dim concat (no relayout).
    xs = jnp.concatenate([x[1:], zrow], axis=0)    # x at col+1
    xns = jnp.concatenate([xn[1:], zrow], axis=0)  # x at row+1, col+1

    # Parity decomposition of ConvTranspose2d(3x3, stride 2, pad 1):
    #   y[2m  ,2p  ] = x[m,p]W11
    #   y[2m  ,2p+1] = x[m,p]W12 + x[m,p+1]W10
    #   y[2m+1,2p  ] = x[m,p]W21 + x[m+1,p]W01
    #   y[2m+1,2p+1] = x[m,p]W22 + x[m,p+1]W20 + x[m+1,p]W02 + x[m+1,p+1]W00
    a = lax.dot_general(x, wa_ref[...], dn, preferred_element_type=f32)
    b = lax.dot_general(xs, wb_ref[...], dn, preferred_element_type=f32)
    c = lax.dot_general(xn, wc_ref[...], dn, preferred_element_type=f32)
    d = lax.dot_general(xns, wd_ref[...], dn, preferred_element_type=f32)

    # Bottom-up 1x1 conv per parity -> accumulator init (no zero fill).
    xbu = xbu_ref[0]
    wbu = wbu_ref[...]
    bu = [lax.dot_general(xbu[:, :, s * cbup:(s + 1) * cbup], wbu, dn,
                          preferred_element_type=f32) for s in range(4)]

    y_ee = bu[0] + a[:, :, 0 * fp:1 * fp]
    y_eo = bu[1] + a[:, :, 1 * fp:2 * fp] + b[:, :, 0:fp]
    y_oe = bu[2] + a[:, :, 2 * fp:3 * fp] + c[:, :, 0:fp]
    y_oo = (bu[3] + a[:, :, 3 * fp:4 * fp] + b[:, :, fp:2 * fp]
            + c[:, :, fp:2 * fp] + d)

    out = jnp.concatenate([y_ee, y_eo, y_oe, y_oo], axis=-1) + bias_ref[...]
    o_ref[0] = out.astype(o_ref.dtype)


# --------------------------------------------------------------------------
# Parameters: PyTorch-layout init + one-time kernel-friendly preparation
# --------------------------------------------------------------------------
def init_fpn_block_params(key, bottom_up_channels, top_down_channels,
                          fused_channels):
    ks = jax.random.split(key, 4)
    scale = 0.05
    params = {}
    if top_down_channels > INTERMEDIATE_CHANNELS:
        params["w_td"] = scale * jax.random.normal(
            ks[0], (INTERMEDIATE_CHANNELS, top_down_channels, 1, 1),
            jnp.float32)
        deconv_in = INTERMEDIATE_CHANNELS
    else:
        deconv_in = top_down_channels
    params["w_bu"] = scale * jax.random.normal(
        ks[1], (fused_channels, bottom_up_channels, 1, 1), jnp.float32)
    # ConvTranspose2d weight layout: (in_channels, out_channels, kH, kW)
    params["w_deconv"] = scale * jax.random.normal(
        ks[2], (deconv_in, fused_channels, 3, 3), jnp.float32)
    params["b_deconv"] = scale * jax.random.normal(
        ks[3], (fused_channels,), jnp.float32)
    return params


def prepare_fpn_params(params, dtype=jnp.bfloat16):
    """One-time weight repack: pad channels to 128-multiples, pack deconv taps
    for the parity decomposition, cast to bf16."""
    cmid, f = params["w_deconv"].shape[0], params["w_deconv"].shape[1]
    cbu = params["w_bu"].shape[1]
    cp, fp, cbup = _round_up(cmid, LANE), _round_up(f, LANE), _round_up(cbu, LANE)

    prep = {"f": f, "fp": fp, "cmid": cmid, "cp": cp, "cbu": cbu,
            "cbup": cbup, "has_td_conv": "w_td" in params}

    if prep["has_td_conv"]:
        w_td = params["w_td"][:, :, 0, 0].T                  # (Ctd, 196)
        prep["w_td"] = jnp.pad(
            w_td, ((0, 0), (0, cp - cmid))).astype(dtype)    # (Ctd, Cp)

    wdc = jnp.pad(params["w_deconv"],
                  ((0, cp - cmid), (0, fp - f), (0, 0), (0, 0)))
    tap = lambda kh, kw: wdc[:, :, kh, kw]                   # (Cp, Fp)
    prep["wa"] = jnp.concatenate(
        [tap(1, 1), tap(1, 2), tap(2, 1), tap(2, 2)], axis=1).astype(dtype)
    prep["wb"] = jnp.concatenate([tap(1, 0), tap(2, 0)], axis=1).astype(dtype)
    prep["wc"] = jnp.concatenate([tap(0, 1), tap(0, 2)], axis=1).astype(dtype)
    prep["wd"] = tap(0, 0).astype(dtype)

    bias = jnp.pad(params["b_deconv"], (0, fp - f))
    prep["bias"] = jnp.tile(bias, 4).reshape(1, 4 * fp).astype(jnp.float32)

    w_bu = params["w_bu"][:, :, 0, 0].T                      # (Cbu, F)
    prep["w_bu"] = jnp.pad(
        w_bu, ((0, cbup - cbu), (0, fp - f))).astype(dtype)  # (Cbup, Fp)
    return prep


# --------------------------------------------------------------------------
# Forward pass
# --------------------------------------------------------------------------
def fpn_block_forward(prep, x_td, x_bu, *, tile_positions=1024,
                      compute_dtype=jnp.bfloat16):
    """x_td, x_bu: NCHW float32 (PyTorch layout). Returns NCHW float32."""
    f, fp = prep["f"], prep["fp"]
    cp, cbu, cbup = prep["cp"], prep["cbu"], prep["cbup"]
    n, ctd, h, w = x_td.shape
    out_pad_h = 1 if f == 128 else 0
    oh, ow = 2 * h - 1 + out_pad_h, 2 * w        # output_padding_w == 1 always

    # --- top-down path: NCHW -> (N, W, H, C) so in-kernel column shifts live
    #     on the leading dim; optional 1x1 channel reduction (Pallas matmul)
    #     writes the padded Cp channels directly.
    x_td_t = jnp.transpose(x_td, (0, 3, 2, 1)).astype(compute_dtype)
    if prep["has_td_conv"]:
        x_mid = _conv1x1_pallas(x_td_t, prep["w_td"], out_dtype=compute_dtype)
    else:
        x_mid = jnp.pad(x_td_t, ((0, 0), (0, 0), (0, 0), (0, cp - ctd)))
    # tile halo: row-shifted copy, x_next[..., r, :] = x_mid[..., r+1, :]
    x_next = jnp.concatenate(
        [x_mid[:, :, 1:, :], jnp.zeros((n, w, 1, cp), x_mid.dtype)], axis=2)

    # --- bottom-up path: rearrange into output-parity planes (N, W, H, 4*Cbup)
    x_bu_t = jnp.transpose(x_bu, (0, 3, 2, 1))               # (N, OW, OH, Cbu)
    x_bu_t = jnp.pad(
        x_bu_t, ((0, 0), (0, 0), (0, 2 * h - oh), (0, cbup - cbu)))
    x_bu_t = x_bu_t.reshape(n, w, 2, h, 2, cbup)             # (n,p,dw,m,dh,c)
    x_bu_t = x_bu_t.transpose(0, 1, 3, 4, 2, 5).reshape(n, w, h, 4 * cbup)
    x_bu_t = x_bu_t.astype(compute_dtype)

    # --- fused deconv (parity decomposition) + bottom-up 1x1 + bias
    th = _pick_row_tile(h, w, tile_positions)
    grid = (n, pl.cdiv(h, th))

    out4 = pl.pallas_call(
        _deconv_parity_kernel,
        out_shape=jax.ShapeDtypeStruct((n, w, h, 4 * fp), jnp.float32),
        grid=grid,
        in_specs=[
            pl.BlockSpec((1, w, th, cp), lambda i, t: (i, 0, t, 0)),
            pl.BlockSpec((1, w, th, cp), lambda i, t: (i, 0, t, 0)),
            pl.BlockSpec((1, w, th, 4 * cbup), lambda i, t: (i, 0, t, 0)),
            pl.BlockSpec((cp, 4 * fp), lambda i, t: (0, 0)),
            pl.BlockSpec((cp, 2 * fp), lambda i, t: (0, 0)),
            pl.BlockSpec((cp, 2 * fp), lambda i, t: (0, 0)),
            pl.BlockSpec((cp, fp), lambda i, t: (0, 0)),
            pl.BlockSpec((cbup, fp), lambda i, t: (0, 0)),
            pl.BlockSpec((1, 4 * fp), lambda i, t: (0, 0)),
        ],
        out_specs=pl.BlockSpec((1, w, th, 4 * fp), lambda i, t: (i, 0, t, 0)),
        compiler_params=pltpu.CompilerParams(
            dimension_semantics=("parallel", "parallel")),
    )(x_mid, x_next, x_bu_t,
      prep["wa"], prep["wb"], prep["wc"], prep["wd"],
      prep["w_bu"], prep["bias"])

    # --- unpack parity planes -> NCHW (single XLA transpose, same glue cost
    #     as the NHWC->NCHW transpose the original module layout needs anyway)
    planes = out4.reshape(n, w, h, 2, 2, fp)[..., :f]        # (n,p,m,dh,dw,f)
    out_nchw = planes.transpose(0, 5, 2, 3, 1, 4).reshape(n, f, 2 * h, 2 * w)
    return out_nchw[:, :, :oh, :ow]


# --------------------------------------------------------------------------
# Pure-JAX f32 reference (module semantics, for correctness check only)
# --------------------------------------------------------------------------
def reference_forward(params, x_td, x_bu, top_down_channels, fused_channels):
    if top_down_channels > INTERMEDIATE_CHANNELS:
        x_td = jnp.einsum("nchw,oc->nohw", x_td, params["w_td"][:, :, 0, 0])
    out_pad = (1, 1) if fused_channels == 128 else (0, 1)
    wt = params["w_deconv"]                                   # (Cin, F, 3, 3)
    rhs = jnp.flip(wt, axis=(2, 3)).transpose(1, 0, 2, 3)     # OIHW
    y = lax.conv_general_dilated(
        x_td, rhs, window_strides=(1, 1),
        padding=((1, 1 + out_pad[0]), (1, 1 + out_pad[1])),
        lhs_dilation=(2, 2), rhs_dilation=(1, 1),
        dimension_numbers=("NCHW", "OIHW", "NCHW"))
    y = y + params["b_deconv"][None, :, None, None]
    z = jnp.einsum("nchw,oc->nohw", x_bu, params["w_bu"][:, :, 0, 0])
    return y + z


# --------------------------------------------------------------------------
if __name__ == "__main__":
    key = jax.random.PRNGKey(0)
    k_params, k_td, k_bu = jax.random.split(key, 3)

    # Small config consistent with the module: top_down_channels > 196 so the
    # optional 1x1 conv path is exercised; fused_channels == 128 -> op=(1,1).
    N = 2
    top_down_channels = 256
    bottom_up_channels = 96
    fused_channels = 128
    H_td, W_td = 8, 8            # top-down feature map
    H_bu, W_bu = 16, 16          # bottom-up feature map (2x larger)

    params = init_fpn_block_params(
        k_params, bottom_up_channels, top_down_channels, fused_channels)
    prep = prepare_fpn_params(params)          # one-time weight repack (bf16)

    x_td = jax.random.normal(k_td, (N, top_down_channels, H_td, W_td),
                             jnp.float32)
    x_bu = jax.random.normal(k_bu, (N, bottom_up_channels, H_bu, W_bu),
                             jnp.float32)

    fwd = jax.jit(lambda a, b: fpn_block_forward(prep, a, b))
    out = jax.block_until_ready(fwd(x_td, x_bu))

    ref = jax.block_until_ready(
        reference_forward(params, x_td, x_bu,
                          top_down_channels, fused_channels))

    assert out.shape == (N, fused_channels, 2 * H_td, 2 * W_td), out.shape
    # Kernels compute the matmuls in bf16 (f32 accumulation); tolerance is
    # tightened vs. the previous 5e-2 but accounts for the bf16 cast.
    np.testing.assert_allclose(np.asarray(out), np.asarray(ref),
                               atol=3e-2, rtol=3e-2)
    print("KERNEL_OK")
</pallas_src>

<mosaic_0001>
module attributes {stable_mosaic.version = 11 : i64} {
  func.func @_matmul_kernel(%arg0: i32, %arg1: memref<128x256xbf16, #tpu.memory_space<vmem>>, %arg2: memref<256x256xbf16, #tpu.memory_space<vmem>>, %arg3: memref<128x256xbf16, #tpu.memory_space<vmem>>) attributes {dimension_semantics = [#tpu.dimension_semantics<parallel>], iteration_bounds = array<i64: 1>, scalar_prefetch = 0 : i64, scratch_operands = 0 : i64, tpu.core_type = #tpu.core_type<tc>, window_params = [{transform_indices = @transform_0, window_bounds = array<i64: 128, 256>}, {pipeline_mode = #tpu.pipeline_mode<synchronous>, transform_indices = @transform_1, window_bounds = array<i64: 256, 256>}, {transform_indices = @transform_2, window_bounds = array<i64: 128, 256>}]} {
    %c0 = arith.constant 0 : index
    %c0_0 = arith.constant 0 : index
    %0 = vector.load %arg1[%c0, %c0_0] : memref<128x256xbf16, #tpu.memory_space<vmem>>, vector<128x256xbf16>
    %c0_1 = arith.constant 0 : index
    %c0_2 = arith.constant 0 : index
    %1 = vector.load %arg2[%c0_1, %c0_2] : memref<256x256xbf16, #tpu.memory_space<vmem>>, vector<256x256xbf16>
    %cst = arith.constant dense<0.000000e+00> : vector<128x256xf32>
    %2 = tpu.matmul %0, %1, %cst {dimension_numbers = #tpu.dot_dimension_numbers<[1], [0], [0], [1], [0, 0, 1, 1], [], []>} : vector<128x256xbf16>, vector<256x256xbf16>, vector<128x256xf32> -> vector<128x256xf32>
    %3 = arith.truncf %2 : vector<128x256xf32> to vector<128x256xbf16>
    %c0_3 = arith.constant 0 : index
    %c0_4 = arith.constant 0 : index
    %4 = vector.load %arg3[%c0_3, %c0_4] : memref<128x256xbf16, #tpu.memory_space<vmem>>, vector<128x256xbf16>
    tpu.vector_store %arg3[%c0_3, %c0_4], %3 {strides = array<i32>} : memref<128x256xbf16, #tpu.memory_space<vmem>>, vector<128x256xbf16>,
    return
  }
  func.func @transform_0(%arg0: i32) -> (i32, i32) {
    %c0_i32 = arith.constant 0 : i32
    %c0_i32_0 = arith.constant 0 : i32
    return %arg0, %c0_i32 : i32, i32
  }
  func.func @transform_1(%arg0: i32) -> (i32, i32) {
    %c0_i32 = arith.constant 0 : i32
    %c0_i32_0 = arith.constant 0 : i32
    %c0_i32_1 = arith.constant 0 : i32
    return %c0_i32, %c0_i32_0 : i32, i32
  }
  func.func @transform_2(%arg0: i32) -> (i32, i32) {
    %c0_i32 = arith.constant 0 : i32
    %c0_i32_0 = arith.constant 0 : i32
    return %arg0, %c0_i32 : i32, i32
  }
}

module attributes {stable_mosaic.version = 11 : i64} {
  func.func @_deconv_parity_kernel(%arg0: i32, %arg1: i32, %arg2: memref<1x8x8x256xbf16, #tpu.memory_space<vmem>>, %arg3: memref<1x8x8x256xbf16, #tpu.memory_space<vmem>>, %arg4: memref<1x8x8x512xbf16, #tpu.memory_space<vmem>>, %arg5: memref<256x512xbf16, #tpu.memory_space<vmem>>, %arg6: memref<256x256xbf16, #tpu.memory_space<vmem>>, %arg7: memref<256x256xbf16, #tpu.memory_space<vmem>>, %arg8: memref<256x128xbf16, #tpu.memory_space<vmem>>, %arg9: memref<128x128xbf16, #tpu.memory_space<vmem>>, %arg10: memref<1x512xf32, #tpu.memory_space<vmem>>, %arg11: memref<1x8x8x512xf32, #tpu.memory_space<vmem>>) attributes {dimension_semantics = [#tpu.dimension_semantics<parallel>, #tpu.dimension_semantics<parallel>], iteration_bounds = array<i64: 2, 1>, scalar_prefetch = 0 : i64, scratch_operands = 0 : i64, tpu.core_type = #tpu.core_type<tc>, window_params = [{transform_indices = @transform_0, window_bounds = array<i64: 1, 8, 8, 256>}, {transform_indices = @transform_1, window_bounds = array<i64: 1, 8, 8, 256>}, {transform_indices = @transform_2, window_bounds = array<i64: 1, 8, 8, 512>}, {pipeline_mode = #tpu.pipeline_mode<synchronous>, transform_indices = @transform_3, window_bounds = array<i64: 256, 512>}, {pipeline_mode = #tpu.pipeline_mode<synchronous>, transform_indices = @transform_4, window_bounds = array<i64: 256, 256>}, {pipeline_mode = #tpu.pipeline_mode<synchronous>, transform_indices = @transform_5, window_bounds = array<i64: 256, 256>}, {pipeline_mode = #tpu.pipeline_mode<synchronous>, transform_indices = @transform_6, window_bounds = array<i64: 256, 128>}, {pipeline_mode = #tpu.pipeline_mode<synchronous>, transform_indices = @transform_7, window_bounds = array<i64: 128, 128>}, {pipeline_mode = #tpu.pipeline_mode<synchronous>, transform_indices = @transform_8, window_bounds = array<i64: 1, 512>}, {transform_indices = @transform_9, window_bounds = array<i64: 1, 8, 8, 512>}]} {
    %c0 = arith.constant 0 : index
    %c0_0 = arith.constant 0 : index
    %c0_1 = arith.constant 0 : index
    %c0_2 = arith.constant 0 : index
    %0 = vector.load %arg2[%c0, %c0_0, %c0_1, %c0_2] : memref<1x8x8x256xbf16, #tpu.memory_space<vmem>>, vector<1x8x8x256xbf16>
    %1 = vector.shape_cast %0 : vector<1x8x8x256xbf16> to vector<8x8x256xbf16>
    %c0_3 = arith.constant 0 : index
    %c0_4 = arith.constant 0 : index
    %c0_5 = arith.constant 0 : index
    %c0_6 = arith.constant 0 : index
    %2 = vector.load %arg3[%c0_3, %c0_4, %c0_5, %c0_6] : memref<1x8x8x256xbf16, #tpu.memory_space<vmem>>, vector<1x8x8x256xbf16>
    %3 = vector.shape_cast %2 : vector<1x8x8x256xbf16> to vector<8x8x256xbf16>
    %cst = arith.constant 0.000000e+00 : bf16
    %4 = vector.broadcast %cst : bf16 to vector<1x8x256xbf16>
    %5 = vector.extract_strided_slice %1 {offsets = [1, 0, 0], sizes = [7, 8, 256], strides = [1, 1, 1]} : vector<8x8x256xbf16> to vector<7x8x256xbf16>
    %6 = tpu.concatenate %5, %4 in 0 : vector<7x8x256xbf16>, vector<1x8x256xbf16> -> vector<8x8x256xbf16>
    %7 = vector.extract_strided_slice %3 {offsets = [1, 0, 0], sizes = [7, 8, 256], strides = [1, 1, 1]} : vector<8x8x256xbf16> to vector<7x8x256xbf16>
    %8 = tpu.concatenate %7, %4 in 0 : vector<7x8x256xbf16>, vector<1x8x256xbf16> -> vector<8x8x256xbf16>
    %c0_7 = arith.constant 0 : index
    %c0_8 = arith.constant 0 : index
    %9 = vector.load %arg5[%c0_7, %c0_8] : memref<256x512xbf16, #tpu.memory_space<vmem>>, vector<256x512xbf16>
    %cst_9 = arith.constant dense<0.000000e+00> : vector<8x8x512xf32>
    %10 = tpu.matmul %1, %9, %cst_9 {dimension_numbers = #tpu.dot_dimension_numbers<[2], [0], [0, 1], [1], [0, 0, 0, 1, 1, 1], [], []>} : vector<8x8x256xbf16>, vector<256x512xbf16>, vector<8x8x512xf32> -> vector<8x8x512xf32>
    %c0_10 = arith.constant 0 : index
    %c0_11 = arith.constant 0 : index
    %11 = vector.load %arg6[%c0_10, %c0_11] : memref<256x256xbf16, #tpu.memory_space<vmem>>, vector<256x256xbf16>
    %cst_12 = arith.constant dense<0.000000e+00> : vector<8x8x256xf32>
    %12 = tpu.matmul %6, %11, %cst_12 {dimension_numbers = #tpu.dot_dimension_numbers<[2], [0], [0, 1], [1], [0, 0, 0, 1, 1, 1], [], []>} : vector<8x8x256xbf16>, vector<256x256xbf16>, vector<8x8x256xf32> -> vector<8x8x256xf32>
    %c0_13 = arith.constant 0 : index
    %c0_14 = arith.constant 0 : index
    %13 = vector.load %arg7[%c0_13, %c0_14] : memref<256x256xbf16, #tpu.memory_space<vmem>>, vector<256x256xbf16>
    %cst_15 = arith.constant dense<0.000000e+00> : vector<8x8x256xf32>
    %14 = tpu.matmul %3, %13, %cst_15 {dimension_numbers = #tpu.dot_dimension_numbers<[2], [0], [0, 1], [1], [0, 0, 0, 1, 1, 1], [], []>} : vector<8x8x256xbf16>, vector<256x256xbf16>, vector<8x8x256xf32> -> vector<8x8x256xf32>
    %c0_16 = arith.constant 0 : index
    %c0_17 = arith.constant 0 : index
    %15 = vector.load %arg8[%c0_16, %c0_17] : memref<256x128xbf16, #tpu.memory_space<vmem>>, vector<256x128xbf16>
    %cst_18 = arith.constant dense<0.000000e+00> : vector<8x8x128xf32>
    %16 = tpu.matmul %8, %15, %cst_18 {dimension_numbers = #tpu.dot_dimension_numbers<[2], [0], [0, 1], [1], [0, 0, 0, 1, 1, 1], [], []>} : vector<8x8x256xbf16>, vector<256x128xbf16>, vector<8x8x128xf32> -> vector<8x8x128xf32>
    %c0_19 = arith.constant 0 : index
    %c0_20 = arith.constant 0 : index
    %c0_21 = arith.constant 0 : index
    %c0_22 = arith.constant 0 : index
    %17 = vector.load %arg4[%c0_19, %c0_20, %c0_21, %c0_22] : memref<1x8x8x512xbf16, #tpu.memory_space<vmem>>, vector<1x8x8x512xbf16>
    %18 = vector.shape_cast %17 : vector<1x8x8x512xbf16> to vector<8x8x512xbf16>
    %c0_23 = arith.constant 0 : index
    %c0_24 = arith.constant 0 : index
    %19 = vector.load %arg9[%c0_23, %c0_24] : memref<128x128xbf16, #tpu.memory_space<vmem>>, vector<128x128xbf16>
    %20 = vector.extract_strided_slice %18 {offsets = [0, 0, 0], sizes = [8, 8, 128], strides = [1, 1, 1]} : vector<8x8x512xbf16> to vector<8x8x128xbf16>
    %cst_25 = arith.constant dense<0.000000e+00> : vector<8x8x128xf32>
    %21 = tpu.matmul %20, %19, %cst_25 {dimension_numbers = #tpu.dot_dimension_numbers<[2], [0], [0, 1], [1], [0, 0, 0, 1, 1, 1], [], []>} : vector<8x8x128xbf16>, vector<128x128xbf16>, vector<8x8x128xf32> -> vector<8x8x128xf32>
    %22 = vector.extract_strided_slice %18 {offsets = [0, 0, 128], sizes = [8, 8, 128], strides = [1, 1, 1]} : vector<8x8x512xbf16> to vector<8x8x128xbf16>
    %cst_26 = arith.constant dense<0.000000e+00> : vector<8x8x128xf32>
    %23 = tpu.matmul %22, %19, %cst_26 {dimension_numbers = #tpu.dot_dimension_numbers<[2], [0], [0, 1], [1], [0, 0, 0, 1, 1, 1], [], []>} : vector<8x8x128xbf16>, vector<128x128xbf16>, vector<8x8x128xf32> -> vector<8x8x128xf32>
    %24 = vector.extract_strided_slice %18 {offsets = [0, 0, 256], sizes = [8, 8, 128], strides = [1, 1, 1]} : vector<8x8x512xbf16> to vector<8x8x128xbf16>
    %cst_27 = arith.constant dense<0.000000e+00> : vector<8x8x128xf32>
    %25 = tpu.matmul %24, %19, %cst_27 {dimension_numbers = #tpu.dot_dimension_numbers<[2], [0], [0, 1], [1], [0, 0, 0, 1, 1, 1], [], []>} : vector<8x8x128xbf16>, vector<128x128xbf16>, vector<8x8x128xf32> -> vector<8x8x128xf32>
    %26 = vector.extract_strided_slice %18 {offsets = [0, 0, 384], sizes = [8, 8, 128], strides = [1, 1, 1]} : vector<8x8x512xbf16> to vector<8x8x128xbf16>
    %cst_28 = arith.constant dense<0.000000e+00> : vector<8x8x128xf32>
    %27 = tpu.matmul %26, %19, %cst_28 {dimension_numbers = #tpu.dot_dimension_numbers<[2], [0], [0, 1], [1], [0, 0, 0, 1, 1, 1], [], []>} : vector<8x8x128xbf16>, vector<128x128xbf16>, vector<8x8x128xf32> -> vector<8x8x128xf32>
    %28 = vector.extract_strided_slice %10 {offsets = [0, 0, 0], sizes = [8, 8, 128], strides = [1, 1, 1]} : vector<8x8x512xf32> to vector<8x8x128xf32>
    %29 = arith.addf %21, %28 : vector<8x8x128xf32>
    %30 = vector.extract_strided_slice %10 {offsets = [0, 0, 128], sizes = [8, 8, 128], strides = [1, 1, 1]} : vector<8x8x512xf32> to vector<8x8x128xf32>
    %31 = arith.addf %23, %30 : vector<8x8x128xf32>
    %32 = vector.extract_strided_slice %12 {offsets = [0, 0, 0], sizes = [8, 8, 128], strides = [1, 1, 1]} : vector<8x8x256xf32> to vector<8x8x128xf32>
    %33 = arith.addf %31, %32 : vector<8x8x128xf32>
    %34 = vector.extract_strided_slice %10 {offsets = [0, 0, 256], sizes = [8, 8, 128], strides = [1, 1, 1]} : vector<8x8x512xf32> to vector<8x8x128xf32>
    %35 = arith.addf %25, %34 : vector<8x8x128xf32>
    %36 = vector.extract_strided_slice %14 {offsets = [0, 0, 0], sizes = [8, 8, 128], strides = [1, 1, 1]} : vector<8x8x256xf32> to vector<8x8x128xf32>
    %37 = arith.addf %35, %36 : vector<8x8x128xf32>
    %38 = vector.extract_strided_slice %10 {offsets = [0, 0, 384], sizes = [8, 8, 128], strides = [1, 1, 1]} : vector<8x8x512xf32> to vector<8x8x128xf32>
    %39 = arith.addf %27, %38 : vector<8x8x128xf32>
    %40 = vector.extract_strided_slice %12 {offsets = [0, 0, 128], sizes = [8, 8, 128], strides = [1, 1, 1]} : vector<8x8x256xf32> to vector<8x8x128xf32>
    %41 = arith.addf %39, %40 : vector<8x8x128xf32>
    %42 = vector.extract_strided_slice %14 {offsets = [0, 0, 128], sizes = [8, 8, 128], strides = [1, 1, 1]} : vector<8x8x256xf32> to vector<8x8x128xf32>
    %43 = arith.addf %41, %42 : vector<8x8x128xf32>
    %44 = arith.addf %43, %16 : vector<8x8x128xf32>
    %45 = tpu.concatenate %29, %33, %37, %44 in 2 : vector<8x8x128xf32>, vector<8x8x128xf32>, vector<8x8x128xf32>, vector<8x8x128xf32> -> vector<8x8x512xf32>
    %c0_29 = arith.constant 0 : index
    %c0_30 = arith.constant 0 : index
    %46 = vector.load %arg10[%c0_29, %c0_30] : memref<1x512xf32, #tpu.memory_space<vmem>>, vector<1x512xf32>
    %47 = vector.shape_cast %46 : vector<1x512xf32> to vector<1x1x512xf32>
    %48 = vector.broadcast %47 : vector<1x1x512xf32> to vector<8x8x512xf32>
    %49 = arith.addf %45, %48 : vector<8x8x512xf32>
    %c0_31 = arith.constant 0 : index
    %c0_32 = arith.constant 0 : index
    %c0_33 = arith.constant 0 : index
    %c0_34 = arith.constant 0 : index
    %50 = vector.load %arg11[%c0_31, %c0_32, %c0_33, %c0_34] : memref<1x8x8x512xf32, #tpu.memory_space<vmem>>, vector<1x8x8x512xf32>
    %51 = vector.shape_cast %50 : vector<1x8x8x512xf32> to vector<8x8x512xf32>
    %52 = vector.shape_cast %49 : vector<8x8x512xf32> to vector<1x8x8x512xf32>
    tpu.vector_store %arg11[%c0_31, %c0_32, %c0_33, %c0_34], %52 {strides = array<i32>} : memref<1x8x8x512xf32, #tpu.memory_space<vmem>>, vector<1x8x8x512xf32>,
    return
  }
  func.func @transform_0(%arg0: i32, %arg1: i32) -> (i32, i32, i32, i32) {
    %c0_i32 = arith.constant 0 : i32
    %c0_i32_0 = arith.constant 0 : i32
    %c0_i32_1 = arith.constant 0 : i32
    return %arg0, %c0_i32, %arg1, %c0_i32_0 : i32, i32, i32, i32
  }
  func.func @transform_1(%arg0: i32, %arg1: i32) -> (i32, i32, i32, i32) {
    %c0_i32 = arith.constant 0 : i32
    %c0_i32_0 = arith.constant 0 : i32
    %c0_i32_1 = arith.constant 0 : i32
    return %arg0, %c0_i32, %arg1, %c0_i32_0 : i32, i32, i32, i32
  }
  func.func @transform_2(%arg0: i32, %arg1: i32) -> (i32, i32, i32, i32) {
    %c0_i32 = arith.constant 0 : i32
    %c0_i32_0 = arith.constant 0 : i32
    %c0_i32_1 = arith.constant 0 : i32
    return %arg0, %c0_i32, %arg1, %c0_i32_0 : i32, i32, i32, i32
  }
  func.func @transform_3(%arg0: i32, %arg1: i32) -> (i32, i32) {
    %c0_i32 = arith.constant 0 : i32
    %c0_i32_0 = arith.constant 0 : i32
    %c0_i32_1 = arith.constant 0 : i32
    return %c0_i32, %c0_i32_0 : i32, i32
  }
  func.func @transform_4(%arg0: i32, %arg1: i32) -> (i32, i32) {
    %c0_i32 = arith.constant 0 : i32
    %c0_i32_0 = arith.constant 0 : i32
    %c0_i32_1 = arith.constant 0 : i32
    return %c0_i32, %c0_i32_0 : i32, i32
  }
  func.func @transform_5(%arg0: i32, %arg1: i32) -> (i32, i32) {
    %c0_i32 = arith.constant 0 : i32
    %c0_i32_0 = arith.constant 0 : i32
    %c0_i32_1 = arith.constant 0 : i32
    return %c0_i32, %c0_i32_0 : i32, i32
  }
  func.func @transform_6(%arg0: i32, %arg1: i32) -> (i32, i32) {
    %c0_i32 = arith.constant 0 : i32
    %c0_i32_0 = arith.constant 0 : i32
    %c0_i32_1 = arith.constant 0 : i32
    return %c0_i32, %c0_i32_0 : i32, i32
  }
  func.func @transform_7(%arg0: i32, %arg1: i32) -> (i32, i32) {
    %c0_i32 = arith.constant 0 : i32
    %c0_i32_0 = arith.constant 0 : i32
    %c0_i32_1 = arith.constant 0 : i32
    return %c0_i32, %c0_i32_0 : i32, i32
  }
  func.func @transform_8(%arg0: i32, %arg1: i32) -> (i32, i32) {
    %c0_i32 = arith.constant 0 : i32
    %c0_i32_0 = arith.constant 0 : i32
    %c0_i32_1 = arith.constant 0 : i32
    return %c0_i32, %c0_i32_0 : i32, i32
  }
  func.func @transform_9(%arg0: i32, %arg1: i32) -> (i32, i32, i32, i32) {
    %c0_i32 = arith.constant 0 : i32
    %c0_i32_0 = arith.constant 0 : i32
    %c0_i32_1 = arith.constant 0 : i32
    return %arg0, %c0_i32, %arg1, %c0_i32_0 : i32, i32, i32, i32
  }
}

</mosaic_0001>

<bundles_post_ra>
// kernel: _lambda_.2
= control target key start
LH: loop header
LB: loop body
LE: loop exit
PB: predicated region body
PF: predicated region fallthrough
CT: control target
= control target key end

     0   :  { %s919_s1 = inlined_call_operand.vmem [shape: bf16[256,256], index: 1, kind: input, shape index: {}]   ;;  %s920_s0 = inlined_call_operand.vmem [shape: bf16[128,256], index: 0, kind: input, shape index: {}]   ;;  %s921_s2 = inlined_call_operand.vmem [shape: bf16[128,256], index: 2, kind: output, shape index: {}]  }
   0x1   :  { %v640_v0 = vld [vmem:[%s919_s1 + $0x4] ss:$8 sps:$4 sm:$0xff]   ;;  %v642_v1 = vld [vmem:[%s919_s1] ss:$8 sps:$4 sm:$0xff]   ;;  %v643_v2 = vld [vmem:[%s919_s1 + $0x14] ss:$8 sps:$4 sm:$0xff]  }
   0x2   :  { %299 = vmatprep.subr.bf16.mxu0 %v640_v0  ;;  %608 = vmatprep.subr.bf16.mxu1 %v640_v0  ;;  %v645_v3 = vld [vmem:[%s919_s1 + $0x10] ss:$8 sps:$4 sm:$0xff]   ;;  %v646_v4 = vld [vmem:[%s919_s1 + $0x24] ss:$8 sps:$4 sm:$0xff]   ;;  %v648_v5 = vld [vmem:[%s919_s1 + $0x20] ss:$8 sps:$4 sm:$0xff]  }
   0x3   :  { %300 = vmatpush1.bf16.msra.mxu0 %v642_v1  ;;  %624 = vmatpush1.bf16.msra.mxu1 %v642_v1  ;;  %v649_v6 = vld [vmem:[%s919_s1 + $0x34] ss:$8 sps:$4 sm:$0xff]   ;;  %v651_v7 = vld [vmem:[%s919_s1 + $0x30] ss:$8 sps:$4 sm:$0xff]   ;;  %v652_v8 = vld [vmem:[%s919_s1 + $0x44] ss:$8 sps:$4 sm:$0xff]  }
   0x4   :  { %301 = vmatprep.subr.bf16.mxu0 %v643_v2  ;;  %609 = vmatprep.subr.bf16.mxu1 %v643_v2  ;;  %v654_v9 = vld [vmem:[%s919_s1 + $0x40] ss:$8 sps:$4 sm:$0xff]   ;;  %v655_v10 = vld [vmem:[%s919_s1 + $0x54] ss:$8 sps:$4 sm:$0xff]   ;;  %v657_v11 = vld [vmem:[%s919_s1 + $0x50] ss:$8 sps:$4 sm:$0xff]  }
   0x5   :  { %v658_v12 = vld [vmem:[%s919_s1 + $0x64] ss:$8 sps:$4 sm:$0xff]   ;;  %v660_v14 = vld [vmem:[%s919_s1 + $0x60] ss:$8 sps:$4 sm:$0xff]   ;;  %v661_v16 = vld [vmem:[%s919_s1 + $0x74] ss:$8 sps:$4 sm:$0xff]  }
   0x6   :  { %v690_v13 = vld [vmem:[%s920_s0 + $0x4] ss:$8 sps:$4 sm:$0xff]   ;;  %v663_v17 = vld [vmem:[%s919_s1 + $0x70] ss:$8 sps:$4 sm:$0xff]   ;;  %v666_v19 = vld [vmem:[%s919_s1 + $0x80] ss:$8 sps:$4 sm:$0xff]  }
   0x7   :  { %302 = vmatpush1.bf16.msra.mxu0 %v645_v3  ;;  %625 = vmatpush1.bf16.msra.mxu1 %v645_v3  ;;  %v693_v15 = vld [vmem:[%s920_s0 + $0x44] ss:$8 sps:$4 sm:$0xff]   ;;  %v667_v20 = vld [vmem:[%s919_s1 + $0x94] ss:$8 sps:$4 sm:$0xff]   ;;  %v669_v21 = vld [vmem:[%s919_s1 + $0x90] ss:$8 sps:$4 sm:$0xff]  }
   0x8   :  { %303 = vmatprep.subr.bf16.mxu0 %v646_v4  ;;  %610 = vmatprep.subr.bf16.mxu1 %v646_v4  ;;  %v664_v18 = vld [vmem:[%s919_s1 + $0x84] ss:$8 sps:$4 sm:$0xff]   ;;  %v672_v23 = vld [vmem:[%s919_s1 + $0xa0] ss:$8 sps:$4 sm:$0xff]   ;;  %v673_v24 = vld [vmem:[%s919_s1 + $0xb4] ss:$8 sps:$4 sm:$0xff]  }
   0x9   :  { %331 = vmatprep.mubr.bf16.mxu0 %v690_v13  ;;  %371 = vmatprep.mubr.bf16.mxu1 %v693_v15  ;;  %v670_v22 = vld [vmem:[%s919_s1 + $0xa4] ss:$8 sps:$4 sm:$0xff]   ;;  %v675_v25 = vld [vmem:[%s919_s1 + $0xb0] ss:$8 sps:$4 sm:$0xff]   ;;  %v678_v27 = vld [vmem:[%s919_s1 + $0xc0] ss:$8 sps:$4 sm:$0xff]  }
   0xa   :  { %v676_v26 = vld [vmem:[%s919_s1 + $0xc4] ss:$8 sps:$4 sm:$0xff]   ;;  %v679_v28 = vld [vmem:[%s919_s1 + $0xd4] ss:$8 sps:$4 sm:$0xff]   ;;  %v681_v29 = vld [vmem:[%s919_s1 + $0xd0] ss:$8 sps:$4 sm:$0xff]  }
   0xb   :  { %304 = vmatpush1.bf16.msra.mxu0 %v648_v5  ;;  %626 = vmatpush1.bf16.msra.mxu1 %v648_v5  ;;  %v682_v30 = vld [vmem:[%s919_s1 + $0xe4] ss:$8 sps:$4 sm:$0xff]   ;;  %v684_v31 = vld [vmem:[%s919_s1 + $0xe0] ss:$8 sps:$4 sm:$0xff]   ;;  %v685_v32 = vld [vmem:[%s919_s1 + $0xf4] ss:$8 sps:$4 sm:$0xff]  }
   0xc   :  { %305 = vmatprep.subr.bf16.mxu0 %v649_v6  ;;  %611 = vmatprep.subr.bf16.mxu1 %v649_v6  ;;  %v687_v33 = vld [vmem:[%s919_s1 + $0xf0] ss:$8 sps:$4 sm:$0xff]   ;;  %v688_v34 = vld [vmem:[%s920_s0] ss:$8 sps:$4 sm:$0xff]   ;;  %v694_v36 = vld [vmem:[%s920_s0 + $0x14] ss:$8 sps:$4 sm:$0xff]  }
   0xd   :  { %v691_v35 = vld [vmem:[%s920_s0 + $0x40] ss:$8 sps:$4 sm:$0xff]   ;;  %v696_v37 = vld [vmem:[%s920_s0 + $0x54] ss:$8 sps:$4 sm:$0xff]   ;;  %v698_v38 = vld [vmem:[%s920_s0 + $0x10] ss:$8 sps:$4 sm:$0xff]  }
   0xe   :  { %v699_v39 = vld [vmem:[%s920_s0 + $0x50] ss:$8 sps:$4 sm:$0xff]   ;;  %v700_v40 = vld [vmem:[%s920_s0 + $0x24] ss:$8 sps:$4 sm:$0xff]   ;;  %v704_v42 = vld [vmem:[%s920_s0 + $0x20] ss:$8 sps:$4 sm:$0xff]  }
   0xf   :  { %306 = vmatpush1.bf16.msra.mxu0 %v651_v7  ;;  %627 = vmatpush1.bf16.msra.mxu1 %v651_v7  ;;  %v702_v41 = vld [vmem:[%s920_s0 + $0x64] ss:$8 sps:$4 sm:$0xff]   ;;  %v705_v43 = vld [vmem:[%s920_s0 + $0x60] ss:$8 sps:$4 sm:$0xff]   ;;  %v706_v44 = vld [vmem:[%s920_s0 + $0x34] ss:$8 sps:$4 sm:$0xff]  }
  0x10   :  { %307 = vmatprep.subr.bf16.mxu0 %v652_v8  ;;  %612 = vmatprep.subr.bf16.mxu1 %v652_v8  ;;  %v708_v45 = vld [vmem:[%s920_s0 + $0x74] ss:$8 sps:$4 sm:$0xff]   ;;  %v710_v46 = vld [vmem:[%s920_s0 + $0x30] ss:$8 sps:$4 sm:$0xff]  }
  0x11   :  { %v711_v47 = vld [vmem:[%s920_s0 + $0x70] ss:$8 sps:$4 sm:$0xff]  }
  0x13   :  { %308 = vmatpush1.bf16.msra.mxu0 %v654_v9  ;;  %628 = vmatpush1.bf16.msra.mxu1 %v654_v9 }
  0x14   :  { %309 = vmatprep.subr.bf16.mxu0 %v655_v10  ;;  %613 = vmatprep.subr.bf16.mxu1 %v655_v10 }
  0x17   :  { %310 = vmatpush1.bf16.msra.mxu0 %v657_v11  ;;  %629 = vmatpush1.bf16.msra.mxu1 %v657_v11 }
  0x18   :  { %311 = vmatprep.subr.bf16.mxu0 %v658_v12  ;;  %614 = vmatprep.subr.bf16.mxu1 %v658_v12 }
  0x1b   :  { %312 = vmatpush1.bf16.msra.mxu0 %v660_v14  ;;  %630 = vmatpush1.bf16.msra.mxu1 %v660_v14 }
  0x1c   :  { %313 = vmatprep.subr.bf16.mxu0 %v661_v16  ;;  %615 = vmatprep.subr.bf16.mxu1 %v661_v16 }
  0x1f   :  { %314 = vmatpush1.bf16.msra.mxu0 %v663_v17  ;;  %631 = vmatpush1.bf16.msra.mxu1 %v663_v17 }
  0x20   :  { %315 = vmatprep.subr.bf16.mxu0 %v664_v18  ;;  %616 = vmatprep.subr.bf16.mxu1 %v664_v18 }
  0x23   :  { %316 = vmatpush1.bf16.msra.mxu0 %v666_v19  ;;  %632 = vmatpush1.bf16.msra.mxu1 %v666_v19 }
  0x24   :  { %317 = vmatprep.subr.bf16.mxu0 %v667_v20  ;;  %617 = vmatprep.subr.bf16.mxu1 %v667_v20 }
  0x27   :  { %318 = vmatpush1.bf16.msra.mxu0 %v669_v21  ;;  %633 = vmatpush1.bf16.msra.mxu1 %v669_v21 }
  0x28   :  { %319 = vmatprep.subr.bf16.mxu0 %v670_v22  ;;  %618 = vmatprep.subr.bf16.mxu1 %v670_v22 }
  0x2b   :  { %320 = vmatpush1.bf16.msra.mxu0 %v672_v23  ;;  %634 = vmatpush1.bf16.msra.mxu1 %v672_v23 }
  0x2c   :  { %321 = vmatprep.subr.bf16.mxu0 %v673_v24  ;;  %619 = vmatprep.subr.bf16.mxu1 %v673_v24 }
  0x2f   :  { %322 = vmatpush1.bf16.msra.mxu0 %v675_v25  ;;  %635 = vmatpush1.bf16.msra.mxu1 %v675_v25 }
  0x30   :  { %323 = vmatprep.subr.bf16.mxu0 %v676_v26  ;;  %620 = vmatprep.subr.bf16.mxu1 %v676_v26 }
  0x33   :  { %324 = vmatpush1.bf16.msra.mxu0 %v678_v27  ;;  %636 = vmatpush1.bf16.msra.mxu1 %v678_v27 }
  0x34   :  { %325 = vmatprep.subr.bf16.mxu0 %v679_v28  ;;  %621 = vmatprep.subr.bf16.mxu1 %v679_v28 }
  0x37   :  { %326 = vmatpush1.bf16.msra.mxu0 %v681_v29  ;;  %637 = vmatpush1.bf16.msra.mxu1 %v681_v29 }
  0x38   :  { %327 = vmatprep.subr.bf16.mxu0 %v682_v30  ;;  %622 = vmatprep.subr.bf16.mxu1 %v682_v30 }
  0x3b   :  { %328 = vmatpush1.bf16.msra.mxu0 %v684_v31  ;;  %638 = vmatpush1.bf16.msra.mxu1 %v684_v31 }
  0x3c   :  { %329 = vmatprep.subr.bf16.mxu0 %v685_v32  ;;  %623 = vmatprep.subr.bf16.mxu1 %v685_v32 }
  0x3f   :  { %330 = vmatpush1.bf16.msra.mxu0 %v687_v33  ;;  %639 = vmatpush1.bf16.msra.mxu1 %v687_v33 }
  0x42   :  { %332 = vmatmul.mubr.bf16.vlgmr.msra.gmra.mrb[0].mxu0 %v688_v34  ;;  %372 = vmatmul.mubr.bf16.vlgmr.msra.gmra.mrb[0].mxu1 %v691_v35 }
  0x43   :  { %341 = vmatprep.mubr.bf16.mxu0 %v694_v36  ;;  %381 = vmatprep.mubr.bf16.mxu1 %v696_v37 }
  0x4a   :  { %342 = vmatmul.mubr.bf16.gmra.mrb[4].mxu0 %v698_v38  ;;  %382 = vmatmul.mubr.bf16.gmra.mrb[4].mxu1 %v699_v39 }
  0x4b   :  { %351 = vmatprep.mubr.bf16.mxu0 %v700_v40  ;;  %391 = vmatprep.mubr.bf16.mxu1 %v702_v41 }
  0x52   :  { %352 = vmatmul.mubr.bf16.gmra.mrb[8].mxu0 %v704_v42  ;;  %392 = vmatmul.mubr.bf16.gmra.mrb[8].mxu1 %v705_v43 }
  0x53   :  { %361 = vmatprep.mubr.bf16.mxu0 %v706_v44  ;;  %401 = vmatprep.mubr.bf16.mxu1 %v708_v45 }
  0x5a   :  { %362 = vmatmul.mubr.bf16.gmra.mrb[12].mxu0 %v710_v46  ;;  %402 = vmatmul.mubr.bf16.gmra.mrb[12].mxu1 %v711_v47 }
 0x115   :  { %v333_v48 = vpop.f32.mrb[0].mxu0  ;;  %v373_v49 = vpop.f32.mrb[0].mxu1 }
 0x116   :  { %v335_v50 = vpop.f32.mrb[1].mxu0  ;;  %v375_v51 = vpop.f32.mrb[1].mxu1 }
 0x117   :  { %v592_v52 = vpack.c.bf16 %v335_v50, %v333_v48  ;;  %v600_v53 = vpack.c.bf16 %v375_v51, %v373_v49  ;;  %v337_v54 = vpop.f32.mrb[2].mxu0  ;;  %v377_v55 = vpop.f32.mrb[2].mxu1 }
 0x118   :  { %v339_v56 = vpop.f32.mrb[3].mxu0  ;;  %v379_v57 = vpop.f32.mrb[3].mxu1 }
 0x119   :  { %508 = vst [vmem:[%s921_s2] sm:$0xff] %v592_v52  ;;  %516 = vst [vmem:[%s921_s2 + $0x40] sm:$0xff] %v600_v53  ;;  %v593_v58 = vpack.c.bf16 %v339_v56, %v337_v54  ;;  %v601_v59 = vpack.c.bf16 %v379_v57, %v377_v55 }
 0x11b   :  { %509 = vst [vmem:[%s921_s2 + $0x8] sm:$0xff] %v593_v58  ;;  %517 = vst [vmem:[%s921_s2 + $0x48] sm:$0xff] %v601_v59 }
 0x11d   :  { %v343_v60 = vpop.f32.mrb[4].mxu0  ;;  %v383_v61 = vpop.f32.mrb[4].mxu1 }
 0x11e   :  { %v345_v62 = vpop.f32.mrb[5].mxu0  ;;  %v385_v63 = vpop.f32.mrb[5].mxu1 }
 0x11f   :  { %v594_v0 = vpack.c.bf16 %v345_v62, %v343_v60  ;;  %v602_v1 = vpack.c.bf16 %v385_v63, %v383_v61  ;;  %v347_v2 = vpop.f32.mrb[6].mxu0  ;;  %v387_v3 = vpop.f32.mrb[6].mxu1 }
 0x120   :  { %v349_v4 = vpop.f32.mrb[7].mxu0  ;;  %v389_v5 = vpop.f32.mrb[7].mxu1 }
 0x121   :  { %510 = vst [vmem:[%s921_s2 + $0x10] sm:$0xff] %v594_v0  ;;  %518 = vst [vmem:[%s921_s2 + $0x50] sm:$0xff] %v602_v1  ;;  %v595_v6 = vpack.c.bf16 %v349_v4, %v347_v2  ;;  %v603_v7 = vpack.c.bf16 %v389_v5, %v387_v3 }
 0x123   :  { %511 = vst [vmem:[%s921_s2 + $0x18] sm:$0xff] %v595_v6  ;;  %519 = vst [vmem:[%s921_s2 + $0x58] sm:$0xff] %v603_v7 }
 0x125   :  { %v353_v8 = vpop.f32.mrb[8].mxu0  ;;  %v393_v9 = vpop.f32.mrb[8].mxu1 }
 0x126   :  { %v355_v10 = vpop.f32.mrb[9].mxu0  ;;  %v395_v11 = vpop.f32.mrb[9].mxu1 }
 0x127   :  { %v596_v12 = vpack.c.bf16 %v355_v10, %v353_v8  ;;  %v604_v13 = vpack.c.bf16 %v395_v11, %v393_v9  ;;  %v357_v14 = vpop.f32.mrb[10].mxu0  ;;  %v397_v15 = vpop.f32.mrb[10].mxu1 }
 0x128   :  { %v359_v16 = vpop.f32.mrb[11].mxu0  ;;  %v399_v17 = vpop.f32.mrb[11].mxu1 }
 0x129   :  { %512 = vst [vmem:[%s921_s2 + $0x20] sm:$0xff] %v596_v12  ;;  %520 = vst [vmem:[%s921_s2 + $0x60] sm:$0xff] %v604_v13  ;;  %v597_v18 = vpack.c.bf16 %v359_v16, %v357_v14  ;;  %v605_v19 = vpack.c.bf16 %v399_v17, %v397_v15 }
 0x12b   :  { %513 = vst [vmem:[%s921_s2 + $0x28] sm:$0xff] %v597_v18  ;;  %521 = vst [vmem:[%s921_s2 + $0x68] sm:$0xff] %v605_v19 }
 0x12d   :  { %v363_v20 = vpop.f32.mrb[12].mxu0  ;;  %v403_v21 = vpop.f32.mrb[12].mxu1 }
 0x12e   :  { %v365_v22 = vpop.f32.mrb[13].mxu0  ;;  %v405_v23 = vpop.f32.mrb[13].mxu1 }
 0x12f   :  { %v598_v24 = vpack.c.bf16 %v365_v22, %v363_v20  ;;  %v606_v25 = vpack.c.bf16 %v405_v23, %v403_v21  ;;  %v367_v26 = vpop.f32.mrb[14].mxu0  ;;  %v407_v27 = vpop.f32.mrb[14].mxu1 }
 0x130   :  { %v369_v28 = vpop.f32.mrb[15].mxu0  ;;  %v409_v29 = vpop.f32.mrb[15].mxu1 }
 0x131   :  { %514 = vst [vmem:[%s921_s2 + $0x30] sm:$0xff] %v598_v24  ;;  %522 = vst [vmem:[%s921_s2 + $0x70] sm:$0xff] %v606_v25  ;;  %v599_v30 = vpack.c.bf16 %v369_v28, %v367_v26  ;;  %v607_v31 = vpack.c.bf16 %v409_v29, %v407_v27 }
 0x133   :  { %515 = vst [vmem:[%s921_s2 + $0x38] sm:$0xff] %v599_v30  ;;  %523 = vst [vmem:[%s921_s2 + $0x78] sm:$0xff] %v607_v31 }

// kernel: _lambda_.3
= control target key start
LH: loop header
LB: loop body
LE: loop exit
PB: predicated region body
PF: predicated region fallthrough
CT: control target
= control target key end

     0   :  { %s3289_s30 = smov 0   ;;  %s3291_s10 = smov 0   ;;  %s4356_s0 = inlined_call_operand.vmem [shape: bf16[2,8,8,256], index: 0, kind: input, shape index: {}]   ;;  %s4357_s1 = inlined_call_operand.vmem [shape: bf16[2,8,8,256], index: 1, kind: input, shape index: {}]   ;;  %s4358_s2 = inlined_call_operand.vmem [shape: bf16[2,8,8,512], index: 2, kind: input, shape index: {}]   ;;  %s4359_s3 = inlined_call_operand.vmem [shape: bf16[256,512], index: 3, kind: input, shape index: {}]   ;;  %s4360_s4 = inlined_call_operand.vmem [shape: bf16[256,256], index: 4, kind: input, shape index: {}]   ;;  %s4361_s5 = inlined_call_operand.vmem [shape: bf16[256,256], index: 5, kind: input, shape index: {}]   ;;  %s4362_s6 = inlined_call_operand.vmem [shape: bf16[256,128], index: 6, kind: input, shape index: {}]   ;;  %s4363_s7 = inlined_call_operand.vmem [shape: bf16[128,128], index: 7, kind: input, shape index: {}]   ;;  %s4364_s8 = inlined_call_operand.vmem [shape: f32[1,512], index: 8, kind: input, shape index: {}]   ;;  %s4365_s9 = inlined_call_operand.vmem [shape: f32[2,8,8,512], index: 9, kind: output, shape index: {}]  }
   0x1   :  { %s3293_s11 = smov 0  }
   0x2 LB: > { %s31_s12 = sadd.s32 1, %s3232_s10  ;;  %p2522_p0 = scmp.ge.s32.totalorder %s3236_s11, 1  ;;  %s3236_s11 = sphi %s3293_s11, %s19_s11   ;;  %s3232_s10 = sphi %s3291_s10, %s4403_s10   ;;  %s3228_s30 = sphi %s3289_s30, %s4402_s30  }
   0x3   : > { %p33_p1 = scmp.ge.s32.totalorder %s31_s12, 2  ;;  %p339_p2 = scmp.lt.s32.totalorder %s3236_s11, 3 }
   0x5   : > { %s4405_s12 = smov (%p33_p1, %s31_s12), 0  ;;  %p340_p3 = pnand %p2522_p0, %p339_p2 }
   0x7   : > { %343 = sbr.rel (%p340_p3) target bundleno = 465 (0x1d1), region = 56 }
   0xe   : > { %v2962_v0 = vld [vmem:[%s4359_s3 + $0x4] ss:$16 sps:$4 sm:$0xff]   ;;  %v2964_v1 = vld [vmem:[%s4359_s3 + $0xc] ss:$16 sps:$4 sm:$0xff]   ;;  %v2966_v2 = vld [vmem:[%s4359_s3] ss:$16 sps:$4 sm:$0xff]  }
   0xf   : > { %878 = vmatprep.subr.bf16.mxu0 %v2962_v0  ;;  %v2967_v3 = vld [vmem:[%s4359_s3 + $0x8] ss:$16 sps:$4 sm:$0xff]   ;;  %951 = vmatprep.subr.bf16.mxu1 %v2964_v1  ;;  %v2968_v4 = vld [vmem:[%s4359_s3 + $0x24] ss:$16 sps:$4 sm:$0xff]   ;;  %v2970_v5 = vld [vmem:[%s4359_s3 + $0x2c] ss:$16 sps:$4 sm:$0xff]  }
  0x10   : > { %879 = vmatpush1.bf16.msra.mxu0 %v2966_v2  ;;  %952 = vmatpush1.bf16.msra.mxu1 %v2967_v3  ;;  %v2972_v6 = vld [vmem:[%s4359_s3 + $0x20] ss:$16 sps:$4 sm:$0xff]   ;;  %v2973_v7 = vld [vmem:[%s4359_s3 + $0x28] ss:$16 sps:$4 sm:$0xff]   ;;  %v2974_v8 = vld [vmem:[%s4359_s3 + $0x44] ss:$16 sps:$4 sm:$0xff]  }
  0x11   : > { %880 = vmatprep.subr.bf16.mxu0 %v2968_v4  ;;  %953 = vmatprep.subr.bf16.mxu1 %v2970_v5  ;;  %v2976_v9 = vld [vmem:[%s4359_s3 + $0x4c] ss:$16 sps:$4 sm:$0xff]   ;;  %v2978_v10 = vld [vmem:[%s4359_s3 + $0x40] ss:$16 sps:$4 sm:$0xff]   ;;  %v2979_v11 = vld [vmem:[%s4359_s3 + $0x48] ss:$16 sps:$4 sm:$0xff]  }
  0x12   : > { %v2980_v12 = vld [vmem:[%s4359_s3 + $0x64] ss:$16 sps:$4 sm:$0xff]   ;;  %v2982_v13 = vld [vmem:[%s4359_s3 + $0x6c] ss:$16 sps:$4 sm:$0xff]   ;;  %v2984_v14 = vld [vmem:[%s4359_s3 + $0x60] ss:$16 sps:$4 sm:$0xff]  }
  0x13   : > { %v2985_v15 = vld [vmem:[%s4359_s3 + $0x68] ss:$16 sps:$4 sm:$0xff]   ;;  %v2986_v16 = vld [vmem:[%s4359_s3 + $0x84] ss:$16 sps:$4 sm:$0xff]   ;;  %v2988_v17 = vld [vmem:[%s4359_s3 + $0x8c] ss:$16 sps:$4 sm:$0xff]  }
  0x14   : > { %881 = vmatpush1.bf16.msra.mxu0 %v2972_v6  ;;  %954 = vmatpush1.bf16.msra.mxu1 %v2973_v7  ;;  %v2990_v18 = vld [vmem:[%s4359_s3 + $0x80] ss:$16 sps:$4 sm:$0xff]   ;;  %v2991_v19 = vld [vmem:[%s4359_s3 + $0x88] ss:$16 sps:$4 sm:$0xff]   ;;  %v2992_v20 = vld [vmem:[%s4359_s3 + $0xa4] ss:$16 sps:$4 sm:$0xff]  }
  0x15   : > { %882 = vmatprep.subr.bf16.mxu0 %v2974_v8  ;;  %955 = vmatprep.subr.bf16.mxu1 %v2976_v9  ;;  %v2994_v21 = vld [vmem:[%s4359_s3 + $0xac] ss:$16 sps:$4 sm:$0xff]   ;;  %v2996_v22 = vld [vmem:[%s4359_s3 + $0xa0] ss:$16 sps:$4 sm:$0xff]   ;;  %v2997_v23 = vld [vmem:[%s4359_s3 + $0xa8] ss:$16 sps:$4 sm:$0xff]  }
  0x16   : > { %v2998_v24 = vld [vmem:[%s4359_s3 + $0xc4] ss:$16 sps:$4 sm:$0xff]   ;;  %v3000_v25 = vld [vmem:[%s4359_s3 + $0xcc] ss:$16 sps:$4 sm:$0xff]   ;;  %v3002_v26 = vld [vmem:[%s4359_s3 + $0xc0] ss:$16 sps:$4 sm:$0xff]  }
  0x17   : > { %v3003_v27 = vld [vmem:[%s4359_s3 + $0xc8] ss:$16 sps:$4 sm:$0xff]   ;;  %v3004_v28 = vld [vmem:[%s4359_s3 + $0xe4] ss:$16 sps:$4 sm:$0xff]   ;;  %v3006_v29 = vld [vmem:[%s4359_s3 + $0xec] ss:$16 sps:$4 sm:$0xff]  }
  0x18   : > { %883 = vmatpush1.bf16.msra.mxu0 %v2978_v10  ;;  %956 = vmatpush1.bf16.msra.mxu1 %v2979_v11  ;;  %v3008_v30 = vld [vmem:[%s4359_s3 + $0xe0] ss:$16 sps:$4 sm:$0xff]   ;;  %v3009_v31 = vld [vmem:[%s4359_s3 + $0xe8] ss:$16 sps:$4 sm:$0xff]   ;;  %v3010_v32 = vld [vmem:[%s4359_s3 + $0x104] ss:$16 sps:$4 sm:$0xff]  }
  0x19   : > { %884 = vmatprep.subr.bf16.mxu0 %v2980_v12  ;;  %957 = vmatprep.subr.bf16.mxu1 %v2982_v13  ;;  %p401_p4 = scmp.lt.s32.totalorder %s3228_s30, 1  ;;  %v3012_v33 = vld [vmem:[%s4359_s3 + $0x10c] ss:$16 sps:$4 sm:$0xff]   ;;  %v3014_v34 = vld [vmem:[%s4359_s3 + $0x100] ss:$16 sps:$4 sm:$0xff]  }
  0x1a   : > { %v3015_v35 = vld [vmem:[%s4359_s3 + $0x108] ss:$16 sps:$4 sm:$0xff]   ;;  %v3016_v36 = vld [vmem:[%s4359_s3 + $0x124] ss:$16 sps:$4 sm:$0xff]   ;;  %v3018_v37 = vld [vmem:[%s4359_s3 + $0x12c] ss:$16 sps:$4 sm:$0xff]  }
  0x1b   : > { %s4407_s30 = smov (!%p401_p4, %s3228_s30), 1  ;;  %v3020_v38 = vld [vmem:[%s4359_s3 + $0x120] ss:$16 sps:$4 sm:$0xff]   ;;  %v3021_v39 = vld [vmem:[%s4359_s3 + $0x128] ss:$16 sps:$4 sm:$0xff]  }
  0x1c   : > { %885 = vmatpush1.bf16.msra.mxu0 %v2984_v14  ;;  %958 = vmatpush1.bf16.msra.mxu1 %v2985_v15  ;;  %v3022_v40 = vld [vmem:[%s4359_s3 + $0x144] ss:$16 sps:$4 sm:$0xff]   ;;  %s2733_s27 = sshll.u32 %s4407_s30, 6  ;;  %v3024_v41 = vld [vmem:[%s4359_s3 + $0x14c] ss:$16 sps:$4 sm:$0xff]   ;;  %s2735_s17 = sshll.u32 %s4407_s30, 7 }
  0x1d   : > { %886 = vmatprep.subr.bf16.mxu0 %v2986_v16  ;;  %959 = vmatprep.subr.bf16.mxu1 %v2988_v17  ;;  %v3026_v42 = vld [vmem:[%s4359_s3 + $0x140] ss:$16 sps:$4 sm:$0xff]   ;;  %v3027_v43 = vld [vmem:[%s4359_s3 + $0x148] ss:$16 sps:$4 sm:$0xff]   ;;  %s3451_s19 = scalar_lea.vmem %s4356_s0, %s2733_s27  ;;  %v3028_v44 = vld [vmem:[%s4359_s3 + $0x164] ss:$16 sps:$4 sm:$0xff]   ;;  %s3627_s21 = scalar_lea.vmem %s4357_s1, %s2733_s27 }
  0x1e   : > { %v3030_v45 = vld [vmem:[%s4359_s3 + $0x16c] ss:$16 sps:$4 sm:$0xff]   ;;  %v438_v46 = vld [vmem:[%s3451_s19] sm:$0xff]  ;;  %v3033_v49 = vld [vmem:[%s4359_s3 + $0x168] ss:$16 sps:$4 sm:$0xff]   ;;  %s3876_s24 = scalar_lea.vmem %s4358_s2, %s2735_s17 }
  0x1f   : > { %v3461_v47 = vld [vmem:[%s3451_s19 + $0x8] sm:$0xff]  ;;  %v3032_v48 = vld [vmem:[%s4359_s3 + $0x160] ss:$16 sps:$4 sm:$0xff]   ;;  %v3034_v51 = vld [vmem:[%s4359_s3 + $0x184] ss:$16 sps:$4 sm:$0xff]  }
  0x20   : > { %887 = vmatpush1.bf16.msra.mxu0 %v2990_v18  ;;  %960 = vmatpush1.bf16.msra.mxu1 %v2991_v19  ;;  %v2532_v50 = vcombine.high %v438_v46, %v3461_v47  ;;  %v3036_v52 = vld [vmem:[%s4359_s3 + $0x18c] ss:$16 sps:$4 sm:$0xff]   ;;  %v3038_v53 = vld [vmem:[%s4359_s3 + $0x180] ss:$16 sps:$4 sm:$0xff]   ;;  %v3039_v54 = vld [vmem:[%s4359_s3 + $0x188] ss:$16 sps:$4 sm:$0xff]   ;;  %v2531_v5 = vcombine.low %v438_v46, %v3461_v47 }
  0x21   : > { %888 = vmatprep.subr.bf16.mxu0 %v2992_v20  ;;  %961 = vmatprep.subr.bf16.mxu1 %v2994_v21  ;;  %v3040_v55 = vld [vmem:[%s4359_s3 + $0x1a4] ss:$16 sps:$4 sm:$0xff]   ;;  %v3042_v56 = vld [vmem:[%s4359_s3 + $0x1ac] ss:$16 sps:$4 sm:$0xff]   ;;  %v3044_v57 = vld [vmem:[%s4359_s3 + $0x1a0] ss:$16 sps:$4 sm:$0xff]  }
  0x22   : > { %910 = vmatprep.mubr.bf16.mxu0 %v2532_v50  ;;  %983 = vmatprep.mubr.bf16.mxu1 %v2532_v50  ;;  %v3045_v58 = vld [vmem:[%s4359_s3 + $0x1a8] ss:$16 sps:$4 sm:$0xff]   ;;  %v3046_v59 = vld [vmem:[%s4359_s3 + $0x1c4] ss:$16 sps:$4 sm:$0xff]   ;;  %v3048_v60 = vld [vmem:[%s4359_s3 + $0x1cc] ss:$16 sps:$4 sm:$0xff]  }
  0x23   : > { %v3050_v61 = vld [vmem:[%s4359_s3 + $0x1c0] ss:$16 sps:$4 sm:$0xff]   ;;  %v3051_v62 = vld [vmem:[%s4359_s3 + $0x1c8] ss:$16 sps:$4 sm:$0xff]   ;;  %v3052_v63 = vld [vmem:[%s4359_s3 + $0x1e4] ss:$16 sps:$4 sm:$0xff]  }
  0x24   : > { %889 = vmatpush1.bf16.msra.mxu0 %v2996_v22  ;;  %962 = vmatpush1.bf16.msra.mxu1 %v2997_v23  ;;  %v3054_v0 = vld [vmem:[%s4359_s3 + $0x1ec] ss:$16 sps:$4 sm:$0xff]   ;;  %v3056_v1 = vld [vmem:[%s4359_s3 + $0x1e0] ss:$16 sps:$4 sm:$0xff]   ;;  %v3057_v2 = vld [vmem:[%s4359_s3 + $0x1e8] ss:$16 sps:$4 sm:$0xff]  }
  0x25   : > { %890 = vmatprep.subr.bf16.mxu0 %v2998_v24  ;;  %963 = vmatprep.subr.bf16.mxu1 %v3000_v25  ;;  %v3062_v3 = vld [vmem:[%s4360_s4 + $0x4] ss:$8 sps:$4 sm:$0xff]   ;;  %v3060_v6 = vld [vmem:[%s4360_s4] ss:$8 sps:$4 sm:$0xff]   ;;  %v3068_v8 = vld [vmem:[%s4360_s4 + $0x14] ss:$8 sps:$4 sm:$0xff]  }
  0x26   : > { %v3065_v4 = vld [vmem:[%s4361_s5 + $0x4] ss:$8 sps:$4 sm:$0xff]   ;;  %v3063_v7 = vld [vmem:[%s4361_s5] ss:$8 sps:$4 sm:$0xff]   ;;  %v3071_v9 = vld [vmem:[%s4361_s5 + $0x14] ss:$8 sps:$4 sm:$0xff]  }
  0x27   : > { %v3066_v10 = vld [vmem:[%s4360_s4 + $0x10] ss:$8 sps:$4 sm:$0xff]   ;;  %v3074_v12 = vld [vmem:[%s4360_s4 + $0x24] ss:$8 sps:$4 sm:$0xff]   ;;  %v3072_v16 = vld [vmem:[%s4360_s4 + $0x20] ss:$8 sps:$4 sm:$0xff]  }
  0x28   : > { %891 = vmatpush1.bf16.msra.mxu0 %v3002_v26  ;;  %964 = vmatpush1.bf16.msra.mxu1 %v3003_v27  ;;  %v3069_v11 = vld [vmem:[%s4361_s5 + $0x10] ss:$8 sps:$4 sm:$0xff]   ;;  %v3077_v13 = vld [vmem:[%s4361_s5 + $0x24] ss:$8 sps:$4 sm:$0xff]   ;;  %v3075_v17 = vld [vmem:[%s4361_s5 + $0x20] ss:$8 sps:$4 sm:$0xff]  }
  0x29   : > { %892 = vmatprep.subr.bf16.mxu0 %v3004_v28  ;;  %965 = vmatprep.subr.bf16.mxu1 %v3006_v29  ;;  %v3550_v14 = vld [vmem:[%s3451_s19 + $0x10] sm:$0xff]  ;;  %v3553_v15 = vld [vmem:[%s3451_s19 + $0x18] sm:$0xff]  ;;  %v3578_v24 = vld [vmem:[%s3451_s19 + $0x20] sm:$0xff] }
  0x2a   : > { %v2534_v18 = vcombine.high %v3550_v14, %v3553_v15  ;;  %v2533_v19 = vcombine.low %v3550_v14, %v3553_v15  ;;  %v3080_v20 = vld [vmem:[%s4360_s4 + $0x34] ss:$8 sps:$4 sm:$0xff]   ;;  %v3078_v22 = vld [vmem:[%s4360_s4 + $0x30] ss:$8 sps:$4 sm:$0xff]   ;;  %v3581_v25 = vld [vmem:[%s3451_s19 + $0x28] sm:$0xff]  ;;  %v2604_v50 = vcombine.high %v3461_v47, %v3550_v14 }
  0x2b   : > { %v3083_v21 = vld [vmem:[%s4361_s5 + $0x34] ss:$8 sps:$4 sm:$0xff]   ;;  %v3081_v23 = vld [vmem:[%s4361_s5 + $0x30] ss:$8 sps:$4 sm:$0xff]   ;;  %v3086_v26 = vld [vmem:[%s4360_s4 + $0x44] ss:$8 sps:$4 sm:$0xff]   ;;  %v2536_v28 = vcombine.high %v3578_v24, %v3581_v25  ;;  %v2535_v29 = vcombine.low %v3578_v24, %v3581_v25 }
  0x2c   : > { %893 = vmatpush1.bf16.msra.mxu0 %v3008_v30  ;;  %966 = vmatpush1.bf16.msra.mxu1 %v3009_v31  ;;  %v3089_v27 = vld [vmem:[%s4361_s5 + $0x44] ss:$8 sps:$4 sm:$0xff]   ;;  %v3084_v30 = vld [vmem:[%s4360_s4 + $0x40] ss:$8 sps:$4 sm:$0xff]  }
  0x2d   : > { %894 = vmatprep.subr.bf16.mxu0 %v3010_v32  ;;  %967 = vmatprep.subr.bf16.mxu1 %v3012_v33  ;;  %v3087_v31 = vld [vmem:[%s4361_s5 + $0x40] ss:$8 sps:$4 sm:$0xff]   ;;  %v3092_v32 = vld [vmem:[%s4360_s4 + $0x54] ss:$8 sps:$4 sm:$0xff]  }
  0x2e   : > { %v3095_v33 = vld [vmem:[%s4361_s5 + $0x54] ss:$8 sps:$4 sm:$0xff]   ;;  %v3647_v46 = vld [vmem:[%s3627_s21 + $0x8] sm:$0xff] }
  0x30   : > { %895 = vmatpush1.bf16.msra.mxu0 %v3014_v34  ;;  %968 = vmatpush1.bf16.msra.mxu1 %v3015_v35  ;;  %v3606_v34 = vld [vmem:[%s3451_s19 + $0x30] sm:$0xff]  ;;  %v3609_v35 = vld [vmem:[%s3451_s19 + $0x38] sm:$0xff] }
  0x31   : > { %896 = vmatprep.subr.bf16.mxu0 %v3016_v36  ;;  %969 = vmatprep.subr.bf16.mxu1 %v3018_v37  ;;  %v3090_v36 = vld [vmem:[%s4360_s4 + $0x50] ss:$8 sps:$4 sm:$0xff]  }
  0x32   : > { %v3093_v37 = vld [vmem:[%s4361_s5 + $0x50] ss:$8 sps:$4 sm:$0xff]  }
  0x34   : > { %897 = vmatpush1.bf16.msra.mxu0 %v3020_v38  ;;  %970 = vmatpush1.bf16.msra.mxu1 %v3021_v39  ;;  %v2538_v38 = vcombine.high %v3606_v34, %v3609_v35  ;;  %v3098_v39 = vld [vmem:[%s4360_s4 + $0x64] ss:$8 sps:$4 sm:$0xff]  }
  0x35   : > { %898 = vmatprep.subr.bf16.mxu0 %v3022_v40  ;;  %971 = vmatprep.subr.bf16.mxu1 %v3024_v41  ;;  %v3101_v40 = vld [vmem:[%s4361_s5 + $0x64] ss:$8 sps:$4 sm:$0xff]   ;;  %v3096_v41 = vld [vmem:[%s4360_s4 + $0x60] ss:$8 sps:$4 sm:$0xff]  }
  0x38   : > { %899 = vmatpush1.bf16.msra.mxu0 %v3026_v42  ;;  %972 = vmatpush1.bf16.msra.mxu1 %v3027_v43  ;;  %v3099_v42 = vld [vmem:[%s4361_s5 + $0x60] ss:$8 sps:$4 sm:$0xff]   ;;  %v3104_v43 = vld [vmem:[%s4360_s4 + $0x74] ss:$8 sps:$4 sm:$0xff]  }
  0x39   : > { %900 = vmatprep.subr.bf16.mxu0 %v3028_v44  ;;  %973 = vmatprep.subr.bf16.mxu1 %v3030_v45  ;;  %v2537_v44 = vcombine.low %v3606_v34, %v3609_v35  ;;  %v3644_v45 = vld [vmem:[%s3627_s21] sm:$0xff] }
  0x3c   : > { %901 = vmatpush1.bf16.msra.mxu0 %v3032_v48  ;;  %974 = vmatpush1.bf16.msra.mxu1 %v3033_v49  ;;  %v3107_v48 = vld [vmem:[%s4361_s5 + $0x74] ss:$8 sps:$4 sm:$0xff]   ;;  %v3102_v49 = vld [vmem:[%s4360_s4 + $0x70] ss:$8 sps:$4 sm:$0xff]  }
  0x3d   : > { %902 = vmatprep.subr.bf16.mxu0 %v3034_v51  ;;  %975 = vmatprep.subr.bf16.mxu1 %v3036_v52  ;;  %v2644_v51 = vcombine.high %v3644_v45, %v3647_v46  ;;  %v3105_v52 = vld [vmem:[%s4361_s5 + $0x70] ss:$8 sps:$4 sm:$0xff]  }
  0x40   : > { %903 = vmatpush1.bf16.msra.mxu0 %v3038_v53  ;;  %976 = vmatpush1.bf16.msra.mxu1 %v3039_v54  ;;  %v3110_v53 = vld [vmem:[%s4360_s4 + $0x84] ss:$8 sps:$4 sm:$0xff]  }
  0x41   : > { %904 = vmatprep.subr.bf16.mxu0 %v3040_v55  ;;  %977 = vmatprep.subr.bf16.mxu1 %v3042_v56  ;;  %v3113_v54 = vld [vmem:[%s4361_s5 + $0x84] ss:$8 sps:$4 sm:$0xff]   ;;  %v3108_v55 = vld [vmem:[%s4360_s4 + $0x80] ss:$8 sps:$4 sm:$0xff]  }
  0x42   : > { %v3111_v56 = vld [vmem:[%s4361_s5 + $0x80] ss:$8 sps:$4 sm:$0xff]  }
  0x44   : > { %905 = vmatpush1.bf16.msra.mxu0 %v3044_v57  ;;  %978 = vmatpush1.bf16.msra.mxu1 %v3045_v58  ;;  %v3116_v57 = vld [vmem:[%s4360_s4 + $0x94] ss:$8 sps:$4 sm:$0xff]  }
  0x45   : > { %906 = vmatprep.subr.bf16.mxu0 %v3046_v59  ;;  %979 = vmatprep.subr.bf16.mxu1 %v3048_v60  ;;  %v3119_v58 = vld [vmem:[%s4361_s5 + $0x94] ss:$8 sps:$4 sm:$0xff]   ;;  %v3114_v59 = vld [vmem:[%s4360_s4 + $0x90] ss:$8 sps:$4 sm:$0xff]  }
  0x46   : > { %v3117_v60 = vld [vmem:[%s4361_s5 + $0x90] ss:$8 sps:$4 sm:$0xff]  }
  0x48   : > { %907 = vmatpush1.bf16.msra.mxu0 %v3050_v61  ;;  %980 = vmatpush1.bf16.msra.mxu1 %v3051_v62  ;;  %v3124_v61 = vld [vmem:[%s4360_s4 + $0xa4] ss:$8 sps:$4 sm:$0xff]  }
  0x49   : > { %908 = vmatprep.subr.bf16.mxu0 %v3052_v63  ;;  %981 = vmatprep.subr.bf16.mxu1 %v3054_v0  ;;  %v3127_v62 = vld [vmem:[%s4361_s5 + $0xa4] ss:$8 sps:$4 sm:$0xff]   ;;  %v3122_v63 = vld [vmem:[%s4360_s4 + $0xa0] ss:$8 sps:$4 sm:$0xff]  }
  0x4a   : > { %v3125_v0 = vld [vmem:[%s4361_s5 + $0xa0] ss:$8 sps:$4 sm:$0xff]  }
  0x4c   : > { %909 = vmatpush1.bf16.msra.mxu0 %v3056_v1  ;;  %982 = vmatpush1.bf16.msra.mxu1 %v3057_v2  ;;  %v3130_v1 = vld [vmem:[%s4360_s4 + $0xb4] ss:$8 sps:$4 sm:$0xff]  }
  0x4d   : > { %1235 = vmatprep.subr.bf16.mxu0 %v3062_v3  ;;  %1540 = vmatprep.subr.bf16.mxu1 %v3065_v4  ;;  %v3133_v2 = vld [vmem:[%s4361_s5 + $0xb4] ss:$8 sps:$4 sm:$0xff]   ;;  %v3128_v3 = vld [vmem:[%s4360_s4 + $0xb0] ss:$8 sps:$4 sm:$0xff]  }
  0x4e   : > { %v3131_v4 = vld [vmem:[%s4361_s5 + $0xb0] ss:$8 sps:$4 sm:$0xff]  }
  0x4f   : > { %911 = vmatmul.mubr.bf16.vlgmr.msra.gmra.mrb[0].mxu0 %v2531_v5  ;;  %984 = vmatmul.mubr.bf16.vlgmr.msra.gmra.mrb[0].mxu1 %v2531_v5  ;;  %v3138_v5 = vld [vmem:[%s4360_s4 + $0xc4] ss:$8 sps:$4 sm:$0xff]  }
  0x50   : > { %1236 = vmatpush1.bf16.msra.mxu0 %v3060_v6  ;;  %1541 = vmatpush1.bf16.msra.mxu1 %v3063_v7  ;;  %v3141_v6 = vld [vmem:[%s4361_s5 + $0xc4] ss:$8 sps:$4 sm:$0xff]   ;;  %v3136_v7 = vld [vmem:[%s4360_s4 + $0xc0] ss:$8 sps:$4 sm:$0xff]  }
  0x51   : > { %1237 = vmatprep.subr.bf16.mxu0 %v3068_v8  ;;  %1542 = vmatprep.subr.bf16.mxu1 %v3071_v9  ;;  %v3139_v8 = vld [vmem:[%s4361_s5 + $0xc0] ss:$8 sps:$4 sm:$0xff]   ;;  %v3144_v9 = vld [vmem:[%s4360_s4 + $0xd4] ss:$8 sps:$4 sm:$0xff]  }
  0x52   : > { %920 = vmatprep.mubr.bf16.mxu0 %v2534_v18  ;;  %993 = vmatprep.mubr.bf16.mxu1 %v2534_v18  ;;  %v3153_v18 = vld [vmem:[%s4361_s5 + $0xe0] ss:$8 sps:$4 sm:$0xff]  }
  0x54   : > { %1238 = vmatpush1.bf16.msra.mxu0 %v3066_v10  ;;  %1543 = vmatpush1.bf16.msra.mxu1 %v3069_v11  ;;  %v3147_v10 = vld [vmem:[%s4361_s5 + $0xd4] ss:$8 sps:$4 sm:$0xff]   ;;  %v3142_v11 = vld [vmem:[%s4360_s4 + $0xd0] ss:$8 sps:$4 sm:$0xff]  }
  0x55   : > { %1239 = vmatprep.subr.bf16.mxu0 %v3074_v12  ;;  %1544 = vmatprep.subr.bf16.mxu1 %v3077_v13  ;;  %v3145_v12 = vld [vmem:[%s4361_s5 + $0xd0] ss:$8 sps:$4 sm:$0xff]   ;;  %v3152_v13 = vld [vmem:[%s4360_s4 + $0xe4] ss:$8 sps:$4 sm:$0xff]  }
  0x57   : > { %921 = vmatmul.mubr.bf16.gmra.mrb[4].mxu0 %v2533_v19  ;;  %994 = vmatmul.mubr.bf16.gmra.mrb[4].mxu1 %v2533_v19  ;;  %v3158_v19 = vld [vmem:[%s4360_s4 + $0xf4] ss:$8 sps:$4 sm:$0xff]  }
  0x58   : > { %1240 = vmatpush1.bf16.msra.mxu0 %v3072_v16  ;;  %1545 = vmatpush1.bf16.msra.mxu1 %v3075_v17  ;;  %v3155_v16 = vld [vmem:[%s4361_s5 + $0xe4] ss:$8 sps:$4 sm:$0xff]   ;;  %v3150_v17 = vld [vmem:[%s4360_s4 + $0xe0] ss:$8 sps:$4 sm:$0xff]  }
  0x59   : > { %1241 = vmatprep.subr.bf16.mxu0 %v3080_v20  ;;  %1546 = vmatprep.subr.bf16.mxu1 %v3083_v21  ;;  %v3161_v20 = vld [vmem:[%s4361_s5 + $0xf4] ss:$8 sps:$4 sm:$0xff]   ;;  %v3156_v21 = vld [vmem:[%s4360_s4 + $0xf0] ss:$8 sps:$4 sm:$0xff]  }
  0x5a   : > { %930 = vmatprep.mubr.bf16.mxu0 %v2536_v28  ;;  %1003 = vmatprep.mubr.bf16.mxu1 %v2536_v28  ;;  %v2603_v28 = vcombine.low %v3461_v47, %v3550_v14  ;;  %v3786_v47 = vld [vmem:[%s4363_s7 + $0x8] sm:$0xff]   ;;  %v2606_v14 = vcombine.high %v3553_v15, %v3578_v24 }
  0x5c   : > { %1242 = vmatpush1.bf16.msra.mxu0 %v3078_v22  ;;  %1547 = vmatpush1.bf16.msra.mxu1 %v3081_v23  ;;  %v3159_v22 = vld [vmem:[%s4361_s5 + $0xf0] ss:$8 sps:$4 sm:$0xff]   ;;  %v3166_v23 = vld [vmem:[%s4362_s6 + $0x40] sm:$0xff]  }
  0x5d   : > { %1243 = vmatprep.subr.bf16.mxu0 %v3086_v26  ;;  %1548 = vmatprep.subr.bf16.mxu1 %v3089_v27  ;;  %v3764_v26 = vld [vmem:[%s4363_s7] sm:$0xff]   ;;  %v2643_v27 = vcombine.low %v3644_v45, %v3647_v46 }
  0x5f   : > { %931 = vmatmul.mubr.bf16.gmra.mrb[8].mxu0 %v2535_v29  ;;  %1004 = vmatmul.mubr.bf16.gmra.mrb[8].mxu1 %v2535_v29  ;;  %v3771_v29 = vld [vmem:[%s3627_s21 + $0x10] sm:$0xff] }
  0x60   : > { %1244 = vmatpush1.bf16.msra.mxu0 %v3084_v30  ;;  %1549 = vmatpush1.bf16.msra.mxu1 %v3087_v31  ;;  %v3774_v30 = vld [vmem:[%s3627_s21 + $0x18] sm:$0xff]  ;;  %v3168_v31 = vld [vmem:[%s4362_s6] sm:$0xff]  }
  0x61   : > { %1245 = vmatprep.subr.bf16.mxu0 %v3092_v32  ;;  %1550 = vmatprep.subr.bf16.mxu1 %v3095_v33  ;;  %v3169_v32 = vld [vmem:[%s4362_s6 + $0x48] sm:$0xff]   ;;  %v2646_v33 = vcombine.high %v3771_v29, %v3774_v30 }
  0x62   : > { %940 = vmatprep.mubr.bf16.mxu0 %v2538_v38  ;;  %1013 = vmatprep.mubr.bf16.mxu1 %v2538_v38  ;;  %v3803_v38 = vld [vmem:[%s4363_s7 + $0x10] sm:$0xff]  }
  0x64   : > { %1246 = vmatpush1.bf16.msra.mxu0 %v3090_v36  ;;  %1551 = vmatpush1.bf16.msra.mxu1 %v3093_v37  ;;  %v3171_v36 = vld [vmem:[%s4362_s6 + $0x8] sm:$0xff]   ;;  %v3176_v37 = vld [vmem:[%s4362_s6 + $0x50] sm:$0xff]  }
  0x65   : > { %1247 = vmatprep.subr.bf16.mxu0 %v3098_v39  ;;  %1552 = vmatprep.subr.bf16.mxu1 %v3101_v40  ;;  %v2605_v39 = vcombine.low %v3553_v15, %v3578_v24  ;;  %v2645_v40 = vcombine.low %v3771_v29, %v3774_v30  ;;  %v3179_v15 = vld [vmem:[%s4362_s6 + $0x58] sm:$0xff]  }
  0x66   : > { %v3826_v24 = vld [vmem:[%s4363_s7 + $0x18] sm:$0xff]  }
  0x67   : > { %941 = vmatmul.mubr.bf16.gmra.mrb[12].mxu0 %v2537_v44  ;;  %1014 = vmatmul.mubr.bf16.gmra.mrb[12].mxu1 %v2537_v44  ;;  %v2608_v44 = vcombine.high %v3581_v25, %v3606_v34 }
  0x68   : > { %1248 = vmatpush1.bf16.msra.mxu0 %v3096_v41  ;;  %1553 = vmatpush1.bf16.msra.mxu1 %v3099_v42  ;;  %v3810_v41 = vld [vmem:[%s3627_s21 + $0x20] sm:$0xff]  ;;  %v3813_v42 = vld [vmem:[%s3627_s21 + $0x28] sm:$0xff] }
  0x69   : > { %1249 = vmatprep.subr.bf16.mxu0 %v3104_v43  ;;  %1554 = vmatprep.subr.bf16.mxu1 %v3107_v48  ;;  %v3178_v43 = vld [vmem:[%s4362_s6 + $0x10] sm:$0xff]   ;;  %v2648_v45 = vcombine.high %v3810_v41, %v3813_v42  ;;  %v3181_v48 = vld [vmem:[%s4362_s6 + $0x18] sm:$0xff]  }
  0x6a   : > { %1267 = vmatprep.mubr.bf16.mxu0 %v2604_v50  ;;  %1572 = vmatprep.mubr.bf16.mxu1 %v2644_v51  ;;  %v3843_v50 = vld [vmem:[%s4363_s7 + $0x20] sm:$0xff]   ;;  %v2607_v51 = vcombine.low %v3581_v25, %v3606_v34  ;;  %v3189_v25 = vld [vmem:[%s4362_s6 + $0x68] sm:$0xff]  }
  0x6b   : > { %v3867_v34 = vld [vmem:[%s4363_s7 + $0x28] sm:$0xff]  }
  0x6c   : > { %1250 = vmatpush1.bf16.msra.mxu0 %v3102_v49  ;;  %1555 = vmatpush1.bf16.msra.mxu1 %v3105_v52  ;;  %v3186_v49 = vld [vmem:[%s4362_s6 + $0x60] sm:$0xff]   ;;  %v2647_v52 = vcombine.low %v3810_v41, %v3813_v42 }
  0x6d   : > { %1251 = vmatprep.subr.bf16.mxu0 %v3110_v53  ;;  %1556 = vmatprep.subr.bf16.mxu1 %v3113_v54  ;;  %v3850_v53 = vld [vmem:[%s3627_s21 + $0x30] sm:$0xff]  ;;  %v3853_v54 = vld [vmem:[%s3627_s21 + $0x38] sm:$0xff] }
  0x70   : > { %1252 = vmatpush1.bf16.msra.mxu0 %v3108_v55  ;;  %1557 = vmatpush1.bf16.msra.mxu1 %v3111_v56  ;;  %v3188_v55 = vld [vmem:[%s4362_s6 + $0x20] sm:$0xff]   ;;  %v3238_v56 = vmov 0  }
  0x71   : > { %1253 = vmatprep.subr.bf16.mxu0 %v3116_v57  ;;  %1558 = vmatprep.subr.bf16.mxu1 %v3119_v58  ;;  %v2610_v57 = vcombine.high %v3609_v35, %v3238_v56  ;;  %v2650_v58 = vcombine.high %v3850_v53, %v3853_v54 }
  0x74   : > { %1254 = vmatpush1.bf16.msra.mxu0 %v3114_v59  ;;  %1559 = vmatpush1.bf16.msra.mxu1 %v3117_v60  ;;  %v3191_v59 = vld [vmem:[%s4362_s6 + $0x28] sm:$0xff]   ;;  %v3194_v60 = vld [vmem:[%s4362_s6 + $0x70] sm:$0xff]  }
  0x75   : > { %1255 = vmatprep.subr.bf16.mxu0 %v3124_v61  ;;  %1560 = vmatprep.subr.bf16.mxu1 %v3127_v62  ;;  %v3889_v61 = vld [vmem:[%s4363_s7 + $0x30] sm:$0xff]   ;;  %v2609_v62 = vcombine.low %v3609_v35, %v3238_v56  ;;  %v3197_v35 = vld [vmem:[%s4362_s6 + $0x78] sm:$0xff]  }
  0x78   : > { %1256 = vmatpush1.bf16.msra.mxu0 %v3122_v63  ;;  %1561 = vmatpush1.bf16.msra.mxu1 %v3125_v0  ;;  %v2649_v63 = vcombine.low %v3850_v53, %v3853_v54  ;;  %v3896_v0 = vld [vmem:[%s3876_s24] sm:$0xff] }
  0x79   : > { %1257 = vmatprep.subr.bf16.mxu0 %v3130_v1  ;;  %1562 = vmatprep.subr.bf16.mxu1 %v3133_v2  ;;  %v3899_v1 = vld [vmem:[%s3876_s24 + $0x10] sm:$0xff] }
  0x7a   : > { %v3196_v2 = vld [vmem:[%s4362_s6 + $0x30] sm:$0xff]  }
  0x7c   : > { %1258 = vmatpush1.bf16.msra.mxu0 %v3128_v3  ;;  %1563 = vmatpush1.bf16.msra.mxu1 %v3131_v4  ;;  %v3912_v3 = vld [vmem:[%s4363_s7 + $0x38] sm:$0xff]   ;;  %v2684_v4 = vcombine.high %v3647_v46, %v3771_v29 }
  0x7d   : > { %1259 = vmatprep.subr.bf16.mxu0 %v3138_v5  ;;  %1564 = vmatprep.subr.bf16.mxu1 %v3141_v6  ;;  %v2707_v5 = vcombine.low %v3896_v0, %v3899_v1  ;;  %v3199_v6 = vld [vmem:[%s4362_s6 + $0x38] sm:$0xff]  }
  0x80   : > { %1260 = vmatpush1.bf16.msra.mxu0 %v3136_v7  ;;  %1565 = vmatpush1.bf16.msra.mxu1 %v3139_v8  ;;  %v3923_v7 = vld [vmem:[%s3876_s24 + $0x20] sm:$0xff]  ;;  %v3926_v8 = vld [vmem:[%s3876_s24 + $0x30] sm:$0xff] }
  0x81   : > { %1261 = vmatprep.subr.bf16.mxu0 %v3144_v9  ;;  %1566 = vmatprep.subr.bf16.mxu1 %v3147_v10  ;;  %v2683_v9 = vcombine.low %v3647_v46, %v3771_v29  ;;  %v2708_v10 = vcombine.low %v3923_v7, %v3926_v8  ;;  %v1991_v29 = vrot.slane %v3896_v0, 4 }
  0x84   : > { %1262 = vmatpush1.bf16.msra.mxu0 %v3142_v11  ;;  %1567 = vmatpush1.bf16.msra.mxu1 %v3145_v12  ;;  %v3934_v11 = vld [vmem:[%s3876_s24 + $0x40] sm:$0xff]  ;;  %v3937_v12 = vld [vmem:[%s3876_s24 + $0x50] sm:$0xff] }
  0x85   : > { %1263 = vmatprep.subr.bf16.mxu0 %v3152_v13  ;;  %1568 = vmatprep.subr.bf16.mxu1 %v3155_v16  ;;  %v2686_v13 = vcombine.high %v3774_v30, %v3810_v41  ;;  %v2709_v46 = vcombine.low %v3934_v11, %v3937_v12  ;;  %v3949_v16 = vld [vmem:[%s3876_s24 + $0x60] sm:$0xff] }
  0x88   : > { %1264 = vmatpush1.bf16.msra.mxu0 %v3150_v17  ;;  %1569 = vmatpush1.bf16.msra.mxu1 %v3153_v18  ;;  %v3952_v17 = vld [vmem:[%s3876_s24 + $0x70] sm:$0xff]  ;;  %v2685_v18 = vcombine.low %v3774_v30, %v3810_v41  ;;  %v1992_v30 = vrot.slane %v3899_v1, 4 }
  0x89   : > { %1265 = vmatprep.subr.bf16.mxu0 %v3158_v19  ;;  %1570 = vmatprep.subr.bf16.mxu1 %v3161_v20  ;;  %v2710_v19 = vcombine.low %v3949_v16, %v3952_v17  ;;  %v3961_v20 = vld [vmem:[%s3876_s24 + $0x8] sm:$0xff] }
  0x8c   : > { %1266 = vmatpush1.bf16.msra.mxu0 %v3156_v21  ;;  %1571 = vmatpush1.bf16.msra.mxu1 %v3159_v22  ;;  %v3964_v21 = vld [vmem:[%s3876_s24 + $0x18] sm:$0xff]  ;;  %v2688_v22 = vcombine.high %v3813_v42, %v3850_v53 }
  0x8d   : > { %2737 = vmatprep.subr.bf16.mxu0 %v3166_v23  ;;  %2825 = vmatprep.subr.bf16.mxu1 %v3764_v26  ;;  %v2723_v23 = vcombine.low %v3961_v20, %v3964_v21 }
  0x8f   : > { %1268 = vmatmul.mubr.bf16.vlgmr.msra.gmra.mrb[16].mxu0 %v2603_v28  ;;  %1573 = vmatmul.mubr.bf16.vlgmr.msra.gmra.mrb[16].mxu1 %v2643_v27  ;;  %v2687_v27 = vcombine.low %v3813_v42, %v3850_v53  ;;  %v2690_v28 = vcombine.high %v3853_v54, %v3238_v56  ;;  %v2185_v53 = vrot.slane %v3961_v20, 4 }
  0x90   : > { %2738 = vmatpush3.bf16.msra.mxu0 %v3168_v31  ;;  %2826 = vmatpush3.bf16.msra.mxu1 %v3764_v26  ;;  %v2689_v31 = vcombine.low %v3853_v54, %v3238_v56  ;;  %v2186_v54 = vrot.slane %v3964_v21, 4 }
  0x91   : > { %2739 = vmatprep.subr.bf16.mxu0 %v3169_v32  ;;  %2827 = vmatprep.subr.bf16.mxu1 %v3786_v47  ;;  %v2719_v32 = vcombine.low %v1991_v29, %v1992_v30 }
  0x92   : > { %1277 = vmatprep.mubr.bf16.mxu0 %v2606_v14  ;;  %1582 = vmatprep.mubr.bf16.mxu1 %v2646_v33  ;;  %v1993_v14 = vrot.slane %v3923_v7, 4  ;;  %v1994_v33 = vrot.slane %v3926_v8, 4 }
  0x94   : > { %2740 = vmatpush3.bf16.msra.mxu0 %v3171_v36  ;;  %2828 = vmatpush3.bf16.msra.mxu1 %v3786_v47  ;;  %v4003_v36 = vld [vmem:[%s3876_s24 + $0x28] sm:$0xff]  ;;  %v2720_v41 = vcombine.low %v1993_v14, %v1994_v33 }
  0x95   : > { %2741 = vmatprep.subr.bf16.mxu0 %v3176_v37  ;;  %2829 = vmatprep.subr.bf16.mxu1 %v3803_v38  ;;  %v4006_v37 = vld [vmem:[%s3876_s24 + $0x38] sm:$0xff] }
  0x96   : > { %v2724_v42 = vcombine.low %v4003_v36, %v4006_v37 }
  0x97   : > { %1278 = vmatmul.mubr.bf16.gmra.mrb[20].mxu0 %v2605_v39  ;;  %1583 = vmatmul.mubr.bf16.gmra.mrb[20].mxu1 %v2645_v40  ;;  %v1995_v39 = vrot.slane %v3934_v11, 4  ;;  %v1996_v40 = vrot.slane %v3937_v12, 4 }
  0x98   : > { %2742 = vmatpush3.bf16.msra.mxu0 %v3178_v43  ;;  %2830 = vmatpush3.bf16.msra.mxu1 %v3803_v38  ;;  %v1831_v43 = vld [vmem:[%s3876_s24 + $0x48] sm:$0xff] }
  0x99   : > { %2743 = vmatprep.subr.bf16.mxu0 %v3179_v15  ;;  %2831 = vmatprep.subr.bf16.mxu1 %v3826_v24  ;;  %v1833_v15 = vld [vmem:[%s3876_s24 + $0x58] sm:$0xff] }
  0x9a   : > { %1287 = vmatprep.mubr.bf16.mxu0 %v2608_v44  ;;  %1592 = vmatprep.mubr.bf16.mxu1 %v2648_v45  ;;  %v2721_v44 = vcombine.low %v1995_v39, %v1996_v40  ;;  %v2725_v45 = vcombine.low %v1831_v43, %v1833_v15 }
  0x9c   : > { %2744 = vmatpush3.bf16.msra.mxu0 %v3181_v48  ;;  %2832 = vmatpush3.bf16.msra.mxu1 %v3826_v24  ;;  %v1997_v48 = vrot.slane %v3949_v16, 4 }
  0x9d   : > { %2745 = vmatprep.subr.bf16.mxu0 %v3186_v49  ;;  %2833 = vmatprep.subr.bf16.mxu1 %v3843_v50  ;;  %v1998_v49 = vrot.slane %v3952_v17, 4 }
  0x9f   : > { %1288 = vmatmul.mubr.bf16.gmra.mrb[24].mxu0 %v2607_v51  ;;  %1593 = vmatmul.mubr.bf16.gmra.mrb[24].mxu1 %v2647_v52  ;;  %v1835_v51 = vld [vmem:[%s3876_s24 + $0x68] sm:$0xff]  ;;  %v1837_v52 = vld [vmem:[%s3876_s24 + $0x78] sm:$0xff]  ;;  %v2722_v56 = vcombine.low %v1997_v48, %v1998_v49  ;;  %s2736_s24 = sshll.u32 %s4407_s30, 8 }
  0xa0   : > { %2746 = vmatpush3.bf16.msra.mxu0 %v3188_v55  ;;  %2834 = vmatpush3.bf16.msra.mxu1 %v3843_v50  ;;  %v2189_v55 = vrot.slane %v1831_v43, 4  ;;  %s4200_s28 = scalar_lea.vmem %s4365_s9, %s2736_s24 }
  0xa1   : > { %2747 = vmatprep.subr.bf16.mxu0 %v3189_v25  ;;  %2835 = vmatprep.subr.bf16.mxu1 %v3867_v34  ;;  %v2190_v25 = vrot.slane %v1833_v15, 4 }
  0xa2   : > { %1297 = vmatprep.mubr.bf16.mxu0 %v2610_v57  ;;  %1602 = vmatprep.mubr.bf16.mxu1 %v2650_v58  ;;  %v2726_v57 = vcombine.low %v1835_v51, %v1837_v52 }
  0xa3   : > { %v2729_v58 = vcombine.low %v2189_v55, %v2190_v25 }
  0xa4   : > { %2748 = vmatpush3.bf16.msra.mxu0 %v3191_v59  ;;  %2836 = vmatpush3.bf16.msra.mxu1 %v3867_v34  ;;  %v2188_v59 = vrot.slane %v4006_v37, 4 }
  0xa5   : > { %2749 = vmatprep.subr.bf16.mxu0 %v3194_v60  ;;  %2837 = vmatprep.subr.bf16.mxu1 %v3889_v61 }
  0xa7   : > { %1298 = vmatmul.mubr.bf16.gmra.mrb[28].mxu0 %v2609_v62  ;;  %1603 = vmatmul.mubr.bf16.gmra.mrb[28].mxu1 %v2649_v63 }
  0xa8   : > { %2750 = vmatpush3.bf16.msra.mxu0 %v3196_v2  ;;  %2838 = vmatpush3.bf16.msra.mxu1 %v3889_v61 }
  0xa9   : > { %2751 = vmatprep.subr.bf16.mxu0 %v3197_v35  ;;  %2839 = vmatprep.subr.bf16.mxu1 %v3912_v3 }
  0xaa   : > { %1789 = vmatprep.mubr.bf16.mxu0 %v2684_v4  ;;  %2841 = vmatprep.mubr.bf16.mxu1 %v2707_v5 }
  0xac   : > { %2752 = vmatpush3.bf16.msra.mxu0 %v3199_v6  ;;  %2840 = vmatpush3.bf16.msra.mxu1 %v3912_v3 }
  0xad   : > { %2849 = vmatprep.subr.bf16.mxu0 %v3764_v26  ;;  %2873 = vmatprep.subr.bf16.mxu1 %v3764_v26 }
  0xaf   : > { %1790 = vmatmul.mubr.bf16.vlgmr.msra.gmra.mrb[32].mxu0 %v2683_v9  ;;  %2842 = vmatmul.mubr.bf16.vlgmr.msra.gmra.mrb[32].mxu1 %v2708_v10 }
  0xb0   : > { %2850 = vmatpush3.bf16.msra.mxu0 %v3764_v26  ;;  %2874 = vmatpush3.bf16.msra.mxu1 %v3764_v26 }
  0xb1   : > { %2851 = vmatprep.subr.bf16.mxu0 %v3786_v47  ;;  %2875 = vmatprep.subr.bf16.mxu1 %v3786_v47 }
  0xb2   : > { %1797 = vmatprep.mubr.bf16.mxu0 %v2686_v13  ;;  %2845 = vmatprep.mubr.bf16.mxu1 %v2709_v46 }
  0xb4   : > { %2852 = vmatpush3.bf16.msra.mxu0 %v3786_v47  ;;  %2876 = vmatpush3.bf16.msra.mxu1 %v3786_v47 }
  0xb5   : > { %2853 = vmatprep.subr.bf16.mxu0 %v3803_v38  ;;  %2877 = vmatprep.subr.bf16.mxu1 %v3803_v38 }
  0xb7   : > { %1798 = vmatmul.mubr.bf16.gmra.mrb[36].mxu0 %v2685_v18  ;;  %2846 = vmatmul.mubr.bf16.gmra.mrb[36].mxu1 %v2710_v19 }
  0xb8   : > { %2854 = vmatpush3.bf16.msra.mxu0 %v3803_v38  ;;  %2878 = vmatpush3.bf16.msra.mxu1 %v3803_v38 }
  0xb9   : > { %2855 = vmatprep.subr.bf16.mxu0 %v3826_v24  ;;  %2879 = vmatprep.subr.bf16.mxu1 %v3826_v24 }
  0xba   : > { %1805 = vmatprep.mubr.bf16.mxu0 %v2688_v22  ;;  %2889 = vmatprep.mubr.bf16.mxu1 %v2723_v23 }
  0xbc   : > { %2856 = vmatpush3.bf16.msra.mxu0 %v3826_v24  ;;  %2880 = vmatpush3.bf16.msra.mxu1 %v3826_v24 }
  0xbd   : > { %2857 = vmatprep.subr.bf16.mxu0 %v3843_v50  ;;  %2881 = vmatprep.subr.bf16.mxu1 %v3843_v50 }
  0xbf   : > { %1806 = vmatmul.mubr.bf16.gmra.mrb[40].mxu0 %v2687_v27 }
  0xc0   : > { %2858 = vmatpush3.bf16.msra.mxu0 %v3843_v50  ;;  %2882 = vmatpush3.bf16.msra.mxu1 %v3843_v50 }
  0xc1   : > { %2859 = vmatprep.subr.bf16.mxu0 %v3867_v34  ;;  %2883 = vmatprep.subr.bf16.mxu1 %v3867_v34 }
  0xc2   : > { %1813 = vmatprep.mubr.bf16.mxu0 %v2690_v28 }
  0xc4   : > { %2860 = vmatpush3.bf16.msra.mxu0 %v3867_v34  ;;  %2884 = vmatpush3.bf16.msra.mxu1 %v3867_v34 }
  0xc5   : > { %2861 = vmatprep.subr.bf16.mxu0 %v3889_v61  ;;  %2885 = vmatprep.subr.bf16.mxu1 %v3889_v61 }
  0xc7   : > { %1814 = vmatmul.mubr.bf16.gmra.mrb[44].mxu0 %v2689_v31 }
  0xc8   : > { %2862 = vmatpush3.bf16.msra.mxu0 %v3889_v61  ;;  %2886 = vmatpush3.bf16.msra.mxu1 %v3889_v61 }
  0xc9   : > { %2863 = vmatprep.subr.bf16.mxu0 %v3912_v3  ;;  %2887 = vmatprep.subr.bf16.mxu1 %v3912_v3 }
  0xca   : > { %2865 = vmatprep.mubr.bf16.mxu0 %v2719_v32 }
  0xcc   : > { %2864 = vmatpush3.bf16.msra.mxu0 %v3912_v3  ;;  %2888 = vmatpush3.bf16.msra.mxu1 %v3912_v3 }
  0xcd   : > { %2897 = vmatprep.subr.bf16.mxu0 %v3764_v26  ;;  %2921 = vmatprep.subr.bf16.mxu1 %v3764_v26 }
  0xcf   : > { %2866 = vmatmul.mubr.bf16.vlgmr.msra.gmra.mrb[48].mxu0 %v2720_v41  ;;  %2890 = vmatmul.mubr.bf16.vlgmr.msra.gmra.mrb[40].mxu1 %v2724_v42 }
  0xd0   : > { %2898 = vmatpush3.bf16.msra.mxu0 %v3764_v26  ;;  %2929 = vmatpush3.bf16.msra.mxu1 %v3764_v26  ;;  %v2727_v26 = vcombine.low %v2185_v53, %v2186_v54 }
  0xd1   : > { %2899 = vmatprep.subr.bf16.mxu0 %v3786_v47  ;;  %2922 = vmatprep.subr.bf16.mxu1 %v3786_v47 }
  0xd2   : > { %2869 = vmatprep.mubr.bf16.mxu0 %v2721_v44  ;;  %2893 = vmatprep.mubr.bf16.mxu1 %v2725_v45 }
  0xd4   : > { %2900 = vmatpush3.bf16.msra.mxu0 %v3786_v47  ;;  %2930 = vmatpush3.bf16.msra.mxu1 %v3786_v47  ;;  %v2191_v47 = vrot.slane %v1835_v51, 4 }
  0xd5   : > { %2901 = vmatprep.subr.bf16.mxu0 %v3803_v38  ;;  %2923 = vmatprep.subr.bf16.mxu1 %v3803_v38 }
  0xd7   : > { %2870 = vmatmul.mubr.bf16.gmra.mrb[52].mxu0 %v2722_v56  ;;  %2894 = vmatmul.mubr.bf16.gmra.mrb[44].mxu1 %v2726_v57 }
  0xd8   : > { %2902 = vmatpush3.bf16.msra.mxu0 %v3803_v38  ;;  %2931 = vmatpush3.bf16.msra.mxu1 %v3803_v38  ;;  %v2192_v38 = vrot.slane %v1837_v52, 4 }
  0xd9   : > { %2903 = vmatprep.subr.bf16.mxu0 %v3826_v24  ;;  %2924 = vmatprep.subr.bf16.mxu1 %v3826_v24 }
  0xda   : > { %2913 = vmatprep.mubr.bf16.mxu0 %v2727_v26  ;;  %2917 = vmatprep.mubr.bf16.mxu1 %v2729_v58  ;;  %v2300_v26 = vlaneseq }
  0xdc   : > { %2904 = vmatpush3.bf16.msra.mxu0 %v3826_v24  ;;  %2932 = vmatpush3.bf16.msra.mxu1 %v3826_v24  ;;  %v2187_v24 = vrot.slane %v4003_v36, 4  ;;  %v4170_v58 = vshrl.u32 %v2300_v26, 7  ;;  %v4192_v26 = vld [vmem:[%s4364_s8] sm:$0xf] }
  0xdd   : > { %2905 = vmatprep.subr.bf16.mxu0 %v3843_v50  ;;  %2925 = vmatprep.subr.bf16.mxu1 %v3843_v50 }
  0xe0   : > { %2906 = vmatpush3.bf16.msra.mxu0 %v3843_v50  ;;  %2933 = vmatpush3.bf16.msra.mxu1 %v3843_v50  ;;  %v2730_v50 = vcombine.low %v2191_v47, %v2192_v38 }
  0xe1   : > { %2907 = vmatprep.subr.bf16.mxu0 %v3867_v34  ;;  %2926 = vmatprep.subr.bf16.mxu1 %v3867_v34 }
  0xe4   : > { %2908 = vmatpush3.bf16.msra.mxu0 %v3867_v34  ;;  %2934 = vmatpush3.bf16.msra.mxu1 %v3867_v34  ;;  %v2728_v34 = vcombine.low %v2187_v24, %v2188_v59 }
  0xe5   : > { %2909 = vmatprep.subr.bf16.mxu0 %v3889_v61  ;;  %2927 = vmatprep.subr.bf16.mxu1 %v3889_v61 }
  0xe8   : > { %2910 = vmatpush3.bf16.msra.mxu0 %v3889_v61  ;;  %2935 = vmatpush3.bf16.msra.mxu1 %v3889_v61 }
  0xe9   : > { %2911 = vmatprep.subr.bf16.mxu0 %v3912_v3  ;;  %2928 = vmatprep.subr.bf16.mxu1 %v3912_v3 }
  0xec   : > { %2912 = vmatpush3.bf16.msra.mxu0 %v3912_v3  ;;  %2936 = vmatpush3.bf16.msra.mxu1 %v3912_v3 }
  0xef   : > { %2914 = vmatmul.mubr.bf16.vlgmr.msra.gmra.mrb[56].mxu0 %v2728_v34  ;;  %2918 = vmatmul.mubr.bf16.vlgmr.msra.gmra.mrb[48].mxu1 %v2730_v50 }
 0x122   : > { %v4058_v60 = vpop.f32.mrb[0].mxu0  ;;  %v4060_v62 = vpop.f32.mrb[0].mxu1 }
 0x123   : > { %v4062_v63 = vpop.f32.mrb[1].mxu0  ;;  %v4064_v0 = vpop.f32.mrb[1].mxu1 }
 0x124   : > { %v4066_v61 = vpop.f32.mrb[2].mxu0  ;;  %v4068_v1 = vpop.f32.mrb[2].mxu1 }
 0x125   : > { %v4070_v2 = vpop.f32.mrb[3].mxu0  ;;  %v4072_v35 = vpop.f32.mrb[3].mxu1 }
 0x126   : > { %4366 = vst [vmem:[#allocation2_spill] sm:$0xff] %v4072_v35 }
 0x12a   : > { %v4074_v4 = vpop.f32.mrb[4].mxu0  ;;  %v4076_v3 = vpop.f32.mrb[4].mxu1 }
 0x12b   : > { %v4078_v5 = vpop.f32.mrb[5].mxu0  ;;  %v4080_v6 = vpop.f32.mrb[5].mxu1 }
 0x12c   : > { %v4082_v7 = vpop.f32.mrb[6].mxu0  ;;  %v4084_v8 = vpop.f32.mrb[6].mxu1 }
 0x12d   : > { %v4086_v9 = vpop.f32.mrb[7].mxu0  ;;  %v4088_v10 = vpop.f32.mrb[7].mxu1 }
 0x12e   : > { %4367 = vst [vmem:[#allocation3_spill] sm:$0xff] %v4088_v10 }
 0x132   : > { %v4090_v11 = vpop.f32.mrb[8].mxu0  ;;  %v4092_v12 = vpop.f32.mrb[8].mxu1 }
 0x133   : > { %v4094_v13 = vpop.f32.mrb[9].mxu0  ;;  %v4096_v46 = vpop.f32.mrb[9].mxu1 }
 0x134   : > { %v4098_v16 = vpop.f32.mrb[10].mxu0  ;;  %v4100_v17 = vpop.f32.mrb[10].mxu1 }
 0x135   : > { %v4102_v18 = vpop.f32.mrb[11].mxu0  ;;  %v4104_v19 = vpop.f32.mrb[11].mxu1 }
 0x136   : > { %4368 = vst [vmem:[#allocation4_spill] sm:$0xff] %v4104_v19 }
 0x13a   : > { %v4106_v20 = vpop.f32.mrb[12].mxu0  ;;  %v4108_v21 = vpop.f32.mrb[12].mxu1 }
 0x13b   : > { %v4110_v22 = vpop.f32.mrb[13].mxu0  ;;  %v4112_v23 = vpop.f32.mrb[13].mxu1 }
 0x13c   : > { %v4114_v27 = vpop.f32.mrb[14].mxu0  ;;  %v4116_v28 = vpop.f32.mrb[14].mxu1 }
 0x13d   : > { %v4118_v29 = vpop.f32.mrb[15].mxu0  ;;  %v4120_v30 = vpop.f32.mrb[15].mxu1 }
 0x13e   : > { %4369 = vst [vmem:[#allocation5_spill] sm:$0xff] %v4120_v30 }
 0x162   : > { %v4122_v31 = vpop.f32.mrb[16].mxu0  ;;  %v4124_v32 = vpop.f32.mrb[16].mxu1 }
 0x163   : > { %v4126_v14 = vpop.f32.mrb[17].mxu0  ;;  %v4128_v33 = vpop.f32.mrb[17].mxu1 }
 0x164   : > { %4370 = vst [vmem:[#allocation6_spill] sm:$0xff] %v4126_v14  ;;  %4371 = vst [vmem:[#allocation7_spill] sm:$0xff] %v4128_v33  ;;  %v4130_v36 = vpop.f32.mrb[18].mxu0  ;;  %v4132_v37 = vpop.f32.mrb[18].mxu1 }
 0x165   : > { %v4134_v39 = vpop.f32.mrb[19].mxu0  ;;  %v4136_v40 = vpop.f32.mrb[19].mxu1 }
 0x166   : > { %4372 = vst [vmem:[#allocation8_spill] sm:$0xff] %v4134_v39  ;;  %4373 = vst [vmem:[#allocation9_spill] sm:$0xff] %v4136_v40 }
 0x16a   : > { %v4138_v41 = vpop.f32.mrb[20].mxu0  ;;  %v4140_v42 = vpop.f32.mrb[20].mxu1 }
 0x16b   : > { %v4142_v43 = vpop.f32.mrb[21].mxu0  ;;  %v4144_v15 = vpop.f32.mrb[21].mxu1 }
 0x16c   : > { %4374 = vst [vmem:[#allocation10_spill] sm:$0xff] %v4144_v15  ;;  %v4146_v44 = vpop.f32.mrb[22].mxu0  ;;  %v4148_v45 = vpop.f32.mrb[22].mxu1 }
 0x16d   : > { %v4150_v48 = vpop.f32.mrb[23].mxu0  ;;  %v4152_v49 = vpop.f32.mrb[23].mxu1 }
 0x16e   : > { %4375 = vst [vmem:[#allocation11_spill] sm:$0xff] %v4150_v48  ;;  %4376 = vst [vmem:[#allocation12_spill] sm:$0xff] %v4152_v49 }
 0x172   : > { %v4154_v51 = vpop.f32.mrb[24].mxu0  ;;  %v4156_v52 = vpop.f32.mrb[24].mxu1 }
 0x173   : > { %v4158_v53 = vpop.f32.mrb[25].mxu0  ;;  %v4160_v54 = vpop.f32.mrb[25].mxu1 }
 0x174   : > { %4377 = vst [vmem:[#allocation13_spill] sm:$0xff] %v4158_v53  ;;  %4378 = vst [vmem:[#allocation14_spill] sm:$0xff] %v4160_v54  ;;  %v4162_v55 = vpop.f32.mrb[26].mxu0  ;;  %v4164_v25 = vpop.f32.mrb[26].mxu1 }
 0x175   : > { %v4166_v56 = vpop.f32.mrb[27].mxu0  ;;  %v4168_v57 = vpop.f32.mrb[27].mxu1 }
 0x176   : > { %4379 = vst [vmem:[#allocation15_spill] sm:$0xff] %v4166_v56  ;;  %4380 = vst [vmem:[#allocation16_spill] sm:$0xff] %v4168_v57  ;;  %v2302_v57 = vsub.s32 0, %v4170_v58 }
 0x178   : > { %v2303_v56 = vrot.slane %v4192_v26, %v2302_v57 }
 0x17a   : > { %v4172_v47 = vpop.f32.mrb[28].mxu0  ;;  %v4174_v38 = vpop.f32.mrb[28].mxu1 }
 0x17b   : > { %v4176_v24 = vpop.f32.mrb[29].mxu0  ;;  %v4178_v59 = vpop.f32.mrb[29].mxu1 }
 0x17c   : > { %4381 = vst [vmem:[#allocation17_spill] sm:$0xff] %v4178_v59  ;;  %v4180_v50 = vpop.f32.mrb[30].mxu0  ;;  %v4182_v34 = vpop.f32.mrb[30].mxu1 }
 0x17d   : > { %v4184_v40 = vpop.f32.mrb[31].mxu0  ;;  %v4186_v49 = vpop.f32.mrb[31].mxu1 }
 0x17e   : > { %4382 = vst [vmem:[#allocation18_spill] sm:$0xff] %v4184_v40  ;;  %4383 = vst [vmem:[#allocation19_spill] sm:$0xff] %v4186_v49 }
 0x182   : > { %v2753_v39 = vpop.f32.mrb[32].mxu0  ;;  %v2843_v54 = vpop.f32.mrb[32].mxu1 }
 0x183   : > { %v1969_v33 = vadd.f32 %v2843_v54, %v4074_v4  ;;  %v2754_v48 = vpop.f32.mrb[33].mxu0  ;;  %v1960_v59 = vpop.f32.mrb[33].mxu1 }
 0x184   : > { %v4202_v49 = vadd.f32 %v2754_v48, %v2753_v39  ;;  %v1961_v40 = vadd.f32 %v1960_v59, %v4058_v60  ;;  %v2756_v57 = vpop.f32.mrb[34].mxu0  ;;  %v2844_v15 = vpop.f32.mrb[34].mxu1 }
 0x185   : > { %v2328_v19 = vadd.f32 %v2303_v56, %v1969_v33  ;;  %v1972_v4 = vadd.f32 %v2844_v15, %v4082_v7  ;;  %v2757_v54 = vpop.f32.mrb[35].mxu0  ;;  %v1963_v35 = vpop.f32.mrb[35].mxu1 }
 0x186   : > { %v2320_v53 = vadd.f32 %v2303_v56, %v1961_v40  ;;  %v4206_v14 = vadd.f32 %v2757_v54, %v2756_v57  ;;  %v1964_v30 = vadd.f32 %v1963_v35, %v4066_v61 }
 0x187   : > { %2360 = vst [vmem:[%s4200_s28 + $0x40] sm:$0xff] %v2328_v19  ;;  %v2332_v10 = vadd.f32 %v2303_v56, %v1972_v4 }
 0x188   : > { %2352 = vst [vmem:[%s4200_s28] sm:$0xff] %v2320_v53  ;;  %v2324_v39 = vadd.f32 %v2303_v56, %v1964_v30 }
 0x189   : > { %2364 = vst [vmem:[%s4200_s28 + $0x60] sm:$0xff] %v2332_v10 }
 0x18a   : > { %2356 = vst [vmem:[%s4200_s28 + $0x20] sm:$0xff] %v2324_v39  ;;  %v2759_v48 = vpop.f32.mrb[36].mxu0  ;;  %v2847_v60 = vpop.f32.mrb[36].mxu1 }
 0x18b   : > { %v1985_v33 = vadd.f32 %v2847_v60, %v4106_v20  ;;  %v2760_v7 = vpop.f32.mrb[37].mxu0  ;;  %v1976_v15 = vpop.f32.mrb[37].mxu1 }
 0x18c   : > { %v4214_v40 = vadd.f32 %v2760_v7, %v2759_v48  ;;  %v1977_v61 = vadd.f32 %v1976_v15, %v4090_v11  ;;  %v2762_v35 = vpop.f32.mrb[38].mxu0  ;;  %v2848_v19 = vpop.f32.mrb[38].mxu1 }
 0x18d   : > { %v2344_v53 = vadd.f32 %v2303_v56, %v1985_v33  ;;  %v1988_v10 = vadd.f32 %v2848_v19, %v4114_v27  ;;  %v2763_v30 = vpop.f32.mrb[39].mxu0  ;;  %v1979_v59 = vpop.f32.mrb[39].mxu1 }
 0x18e   : > { %v2336_v57 = vadd.f32 %v2303_v56, %v1977_v61  ;;  %v4218_v4 = vadd.f32 %v2763_v30, %v2762_v35  ;;  %v1980_v20 = vadd.f32 %v1979_v59, %v4098_v16 }
 0x18f   : > { %2376 = vst [vmem:[%s4200_s28 + $0xc0] sm:$0xff] %v2344_v53  ;;  %v2348_v54 = vadd.f32 %v2303_v56, %v1988_v10  ;;  %v2310_v10 = vsub.s32 2, %v4170_v58 }
 0x190   : > { %2368 = vst [vmem:[%s4200_s28 + $0x80] sm:$0xff] %v2336_v57  ;;  %v2340_v39 = vadd.f32 %v2303_v56, %v1980_v20  ;;  %v2306_v56 = vsub.s32 1, %v4170_v58 }
 0x191   : > { %2380 = vst [vmem:[%s4200_s28 + $0xe0] sm:$0xff] %v2348_v54 }
 0x192   : > { %2372 = vst [vmem:[%s4200_s28 + $0xa0] sm:$0xff] %v2340_v39  ;;  %v2765_v48 = vpop.f32.mrb[40].mxu0  ;;  %v4237_v20 = vrot.slane %v4192_v26, %v2306_v56  ;;  %v4241_v39 = vrot.slane %v4192_v26, %v2310_v10 }
 0x193   : > { %v2766_v11 = vpop.f32.mrb[41].mxu0 }
 0x194   : > { %v4225_v60 = vadd.f32 %v2766_v11, %v2765_v48  ;;  %v2768_v33 = vpop.f32.mrb[42].mxu0 }
 0x195   : > { %v2769_v7 = vpop.f32.mrb[43].mxu0 }
 0x196   : > { %v4227_v27 = vadd.f32 %v2769_v7, %v2768_v33 }
 0x19a   : > { %v2771_v15 = vpop.f32.mrb[44].mxu0 }
 0x19b   : > { %v2772_v61 = vpop.f32.mrb[45].mxu0 }
 0x19c   : > { %v4229_v35 = vadd.f32 %v2772_v61, %v2771_v15  ;;  %v2774_v19 = vpop.f32.mrb[46].mxu0 }
 0x19d   : > { %v2775_v16 = vpop.f32.mrb[47].mxu0 }
 0x19e   : > { %v4231_v53 = vadd.f32 %v2775_v16, %v2774_v19 }
 0x1a2   : > { %v2867_v30 = vpop.f32.mrb[48].mxu0  ;;  %v2891_v59 = vpop.f32.mrb[40].mxu1 }
 0x1a3   : > { %v2058_v57 = vadd.f32 %v2867_v30, %v4078_v5  ;;  %v2155_v54 = vadd.f32 %v2891_v59, %v4076_v3  ;;  %v2049_v48 = vpop.f32.mrb[49].mxu0  ;;  %v2146_v11 = vpop.f32.mrb[41].mxu1 }
 0x1a4   : > { %v2050_v33 = vadd.f32 %v2049_v48, %v4062_v63  ;;  %v2147_v7 = vadd.f32 %v2146_v11, %v4060_v62  ;;  %v2868_v15 = vpop.f32.mrb[50].mxu0  ;;  %v2892_v61 = vpop.f32.mrb[42].mxu1 }
 0x1a5   : > { %v2082_v19 = vadd.f32 %v2058_v57, %v4138_v41  ;;  %v2179_v5 = vadd.f32 %v2155_v54, %v4140_v42  ;;  %v2061_v16 = vadd.f32 %v2868_v15, %v4086_v9  ;;  %v2158_v3 = vadd.f32 %v2892_v61, %v4084_v8  ;;  %v2052_v56 = vpop.f32.mrb[51].mxu0  ;;  %v2149_v10 = vpop.f32.mrb[43].mxu1 }
 0x1a6   : > { %v2080_v30 = vadd.f32 %v2050_v33, %v4122_v31  ;;  %v2177_v63 = vadd.f32 %v2147_v7, %v4124_v32  ;;  %v2053_v62 = vadd.f32 %v2052_v56, %v4070_v2  ;;  %v2150_v41 = vadd.f32 %v2149_v10, %v4068_v1 }
 0x1a7   : > { %v2329_v42 = vadd.f32 %v4237_v20, %v2082_v19  ;;  %v2330_v9 = vadd.f32 %v4241_v39, %v2179_v5  ;;  %v2083_v59 = vadd.f32 %v2061_v16, %v4146_v44  ;;  %v2180_v8 = vadd.f32 %v2158_v3, %v4148_v45 }
 0x1a8   : > { %v2321_v31 = vadd.f32 %v4237_v20, %v2080_v30  ;;  %v2322_v57 = vadd.f32 %v4241_v39, %v2177_v63  ;;  %v2081_v32 = vadd.f32 %v2053_v62, %v4130_v36  ;;  %v2178_v2 = vadd.f32 %v2150_v41, %v4132_v37 }
 0x1a9   : > { %2361 = vst [vmem:[%s4200_s28 + $0x48] sm:$0xff] %v2329_v42  ;;  %2362 = vst [vmem:[%s4200_s28 + $0x50] sm:$0xff] %v2330_v9  ;;  %v2333_v1 = vadd.f32 %v4237_v20, %v2083_v59  ;;  %v2334_v44 = vadd.f32 %v4241_v39, %v2180_v8 }
 0x1aa   : > { %2353 = vst [vmem:[%s4200_s28 + $0x8] sm:$0xff] %v2321_v31  ;;  %2354 = vst [vmem:[%s4200_s28 + $0x10] sm:$0xff] %v2322_v57  ;;  %v2325_v45 = vadd.f32 %v4237_v20, %v2081_v32  ;;  %v2326_v54 = vadd.f32 %v4241_v39, %v2178_v2  ;;  %v2871_v48 = vpop.f32.mrb[52].mxu0  ;;  %v2895_v11 = vpop.f32.mrb[44].mxu1 }
 0x1ab   : > { %2365 = vst [vmem:[%s4200_s28 + $0x68] sm:$0xff] %v2333_v1  ;;  %2366 = vst [vmem:[%s4200_s28 + $0x70] sm:$0xff] %v2334_v44  ;;  %v2074_v36 = vadd.f32 %v2871_v48, %v4110_v22  ;;  %v2171_v37 = vadd.f32 %v2895_v11, %v4108_v21  ;;  %v2065_v33 = vpop.f32.mrb[53].mxu0  ;;  %v2162_v7 = vpop.f32.mrb[45].mxu1  ;;  %v4384_v44 = vld [vmem:[#allocation3_spill] sm:$0xff]  ;;  %v4386_v11 = vld [vmem:[#allocation6_spill] sm:$0xff] }
 0x1ac   : > { %2357 = vst [vmem:[%s4200_s28 + $0x28] sm:$0xff] %v2325_v45  ;;  %2358 = vst [vmem:[%s4200_s28 + $0x30] sm:$0xff] %v2326_v54  ;;  %v2066_v15 = vadd.f32 %v2065_v33, %v4094_v13  ;;  %v2163_v61 = vadd.f32 %v2162_v7, %v4092_v12  ;;  %v2872_v19 = vpop.f32.mrb[54].mxu0  ;;  %v2896_v5 = vpop.f32.mrb[46].mxu1  ;;  %v4385_v54 = vld [vmem:[#allocation5_spill] sm:$0xff]  ;;  %v4388_v33 = vld [vmem:[#allocation2_spill] sm:$0xff] }
 0x1ad   : > { %v2086_v16 = vadd.f32 %v2074_v36, %v4172_v47  ;;  %v2183_v3 = vadd.f32 %v2171_v37, %v4174_v38  ;;  %v2077_v56 = vadd.f32 %v2872_v19, %v4118_v29  ;;  %v2174_v22 = vadd.f32 %v2896_v5, %v4116_v28  ;;  %v2068_v21 = vpop.f32.mrb[55].mxu0  ;;  %v2165_v10 = vpop.f32.mrb[47].mxu1  ;;  %v4387_v37 = vld [vmem:[#allocation13_spill] sm:$0xff]  ;;  %v4389_v7 = vld [vmem:[#allocation4_spill] sm:$0xff]  ;;  %v4392_v5 = vld [vmem:[#allocation11_spill] sm:$0xff] }
 0x1ae   : > { %v2084_v30 = vadd.f32 %v2066_v15, %v4154_v51  ;;  %v2181_v13 = vadd.f32 %v2163_v61, %v4156_v52  ;;  %v2069_v12 = vadd.f32 %v2068_v21, %v4102_v18  ;;  %v2166_v47 = vadd.f32 %v2165_v10, %v4100_v17  ;;  %v4390_v15 = vld [vmem:[#allocation10_spill] sm:$0xff]  ;;  %v4391_v19 = vld [vmem:[#allocation17_spill] sm:$0xff] }
 0x1af   : > { %v2345_v38 = vadd.f32 %v4237_v20, %v2086_v16  ;;  %v2346_v29 = vadd.f32 %v4241_v39, %v2183_v3  ;;  %v2087_v28 = vadd.f32 %v2077_v56, %v4180_v50  ;;  %v2184_v63 = vadd.f32 %v2174_v22, %v4182_v34  ;;  %v4393_v16 = vld [vmem:[#allocation18_spill] sm:$0xff]  ;;  %v4394_v56 = vld [vmem:[#allocation7_spill] sm:$0xff] }
 0x1b0   : > { %v2337_v51 = vadd.f32 %v4237_v20, %v2084_v30  ;;  %v2338_v52 = vadd.f32 %v4241_v39, %v2181_v13  ;;  %v2085_v18 = vadd.f32 %v2069_v12, %v4162_v55  ;;  %v2182_v17 = vadd.f32 %v2166_v47, %v4164_v25  ;;  %v4395_v21 = vld [vmem:[#allocation14_spill] sm:$0xff]  ;;  %v4396_v30 = vld [vmem:[#allocation8_spill] sm:$0xff]  ;;  %v4397_v12 = vld [vmem:[#allocation15_spill] sm:$0xff] }
 0x1b1   : > { %2377 = vst [vmem:[%s4200_s28 + $0xc8] sm:$0xff] %v2345_v38  ;;  %2378 = vst [vmem:[%s4200_s28 + $0xd0] sm:$0xff] %v2346_v29  ;;  %v2349_v62 = vadd.f32 %v4237_v20, %v2087_v28  ;;  %v2350_v41 = vadd.f32 %v4241_v39, %v2184_v63  ;;  %v2314_v55 = vsub.s32 3, %v4170_v58  ;;  %v4398_v28 = vld [vmem:[#allocation12_spill] sm:$0xff] }
 0x1b2   : > { %2369 = vst [vmem:[%s4200_s28 + $0x88] sm:$0xff] %v2337_v51  ;;  %2370 = vst [vmem:[%s4200_s28 + $0x90] sm:$0xff] %v2338_v52  ;;  %v2341_v50 = vadd.f32 %v4237_v20, %v2085_v18  ;;  %v2342_v34 = vadd.f32 %v4241_v39, %v2182_v17  ;;  %v4399_v51 = vld [vmem:[#allocation19_spill] sm:$0xff] }
 0x1b3   : > { %2381 = vst [vmem:[%s4200_s28 + $0xe8] sm:$0xff] %v2349_v62  ;;  %2382 = vst [vmem:[%s4200_s28 + $0xf0] sm:$0xff] %v2350_v41  ;;  %v2315_v57 = vrot.slane %v4192_v26, %v2314_v55  ;;  %v4400_v62 = vld [vmem:[#allocation9_spill] sm:$0xff] }
 0x1b4   : > { %2373 = vst [vmem:[%s4200_s28 + $0xa8] sm:$0xff] %v2341_v50  ;;  %2374 = vst [vmem:[%s4200_s28 + $0xb0] sm:$0xff] %v2342_v34  ;;  %v4401_v50 = vld [vmem:[#allocation16_spill] sm:$0xff] }
 0x1c2   : > { %v2915_v42 = vpop.f32.mrb[56].mxu0  ;;  %v2919_v25 = vpop.f32.mrb[48].mxu1 }
 0x1c3   : > { %v2252_v9 = vadd.f32 %v2915_v42, %v4080_v6  ;;  %v2268_v59 = vadd.f32 %v2919_v25, %v4112_v23  ;;  %v2243_v8 = vpop.f32.mrb[57].mxu0  ;;  %v2259_v31 = vpop.f32.mrb[49].mxu1 }
 0x1c4   : > { %v2244_v20 = vadd.f32 %v2243_v8, %v4064_v0  ;;  %v2260_v39 = vadd.f32 %v2259_v31, %v4096_v46  ;;  %v2916_v32 = vpop.f32.mrb[58].mxu0  ;;  %v2920_v2 = vpop.f32.mrb[50].mxu1 }
 0x1c5   : > { %v2276_v1 = vadd.f32 %v2252_v9, %v4142_v43  ;;  %v2280_v58 = vadd.f32 %v2268_v59, %v4176_v24  ;;  %v2255_v45 = vadd.f32 %v2916_v32, %v4384_v44  ;;  %v2271_v6 = vadd.f32 %v2920_v2, %v4385_v54  ;;  %v2246_v48 = vpop.f32.mrb[59].mxu0  ;;  %v2262_v23 = vpop.f32.mrb[51].mxu1 }
 0x1c6   : > { %v2274_v36 = vadd.f32 %v2244_v20, %v4386_v11  ;;  %v2278_v26 = vadd.f32 %v2260_v39, %v4387_v37  ;;  %v2247_v0 = vadd.f32 %v2246_v48, %v4388_v33  ;;  %v2263_v46 = vadd.f32 %v2262_v23, %v4389_v7 }
 0x1c7   : > { %v2284_v61 = vadd.f32 %v2276_v1, %v4390_v15  ;;  %v2288_v43 = vadd.f32 %v2280_v58, %v4391_v19  ;;  %v2277_v24 = vadd.f32 %v2255_v45, %v4392_v5  ;;  %v2281_v3 = vadd.f32 %v2271_v6, %v4393_v16 }
 0x1c8   : > { %v2282_v22 = vadd.f32 %v2274_v36, %v4394_v56  ;;  %v2286_v10 = vadd.f32 %v2278_v26, %v4395_v21  ;;  %v2275_v13 = vadd.f32 %v2247_v0, %v4396_v30  ;;  %v2279_v47 = vadd.f32 %v2263_v46, %v4397_v12 }
 0x1c9   : > { %v2292_v38 = vadd.f32 %v4214_v40, %v2284_v61  ;;  %v2296_v29 = vadd.f32 %v4229_v35, %v2288_v43  ;;  %v2285_v63 = vadd.f32 %v2277_v24, %v4398_v28  ;;  %v2289_v52 = vadd.f32 %v2281_v3, %v4399_v51 }
 0x1ca   : > { %v2290_v18 = vadd.f32 %v4202_v49, %v2282_v22  ;;  %v2294_v17 = vadd.f32 %v4225_v60, %v2286_v10  ;;  %v2283_v41 = vadd.f32 %v2275_v13, %v4400_v62  ;;  %v2287_v34 = vadd.f32 %v2279_v47, %v4401_v50 }
 0x1cb   : > { %v2331_v55 = vadd.f32 %v2315_v57, %v2292_v38  ;;  %v2347_v40 = vadd.f32 %v2315_v57, %v2296_v29  ;;  %v2293_v35 = vadd.f32 %v4218_v4, %v2285_v63  ;;  %v2297_v42 = vadd.f32 %v4231_v53, %v2289_v52 }
 0x1cc   : > { %v2323_v25 = vadd.f32 %v2315_v57, %v2290_v18  ;;  %v2339_v49 = vadd.f32 %v2315_v57, %v2294_v17  ;;  %v2291_v9 = vadd.f32 %v4206_v14, %v2283_v41  ;;  %v2295_v60 = vadd.f32 %v4227_v27, %v2287_v34 }
 0x1cd   : > { %2363 = vst [vmem:[%s4200_s28 + $0x58] sm:$0xff] %v2331_v55  ;;  %2379 = vst [vmem:[%s4200_s28 + $0xd8] sm:$0xff] %v2347_v40  ;;  %v2335_v59 = vadd.f32 %v2315_v57, %v2293_v35  ;;  %v2351_v8 = vadd.f32 %v2315_v57, %v2297_v42 }
 0x1ce   : > { %2355 = vst [vmem:[%s4200_s28 + $0x18] sm:$0xff] %v2323_v25  ;;  %2371 = vst [vmem:[%s4200_s28 + $0x98] sm:$0xff] %v2339_v49  ;;  %v2327_v31 = vadd.f32 %v2315_v57, %v2291_v9  ;;  %v2343_v20 = vadd.f32 %v2315_v57, %v2295_v60 }
 0x1cf   : > { %2367 = vst [vmem:[%s4200_s28 + $0x78] sm:$0xff] %v2335_v59  ;;  %2383 = vst [vmem:[%s4200_s28 + $0xf8] sm:$0xff] %v2351_v8 }
 0x1d0   : > { %2359 = vst [vmem:[%s4200_s28 + $0x38] sm:$0xff] %v2327_v31  ;;  %2375 = vst [vmem:[%s4200_s28 + $0xb8] sm:$0xff] %v2343_v20 }
 0x1d1 PF: > { %s19_s11 = sadd.s32 1, %s3236_s11   ;;  %s4402_s30 = smov %s3232_s10 }
 0x1d2   : > { %p16_p5 = scmp.ge.s32.totalorder %s19_s11, 4   ;;  %s4403_s10 = smov %s4405_s12 }
 0x1d4   :  { %18 = sbr.rel (!%p16_p5) target bundleno = 2 (0x2), region = 92 }

</bundles_post_ra>
